<compile_context>
chip_gen: v5e
topology: v5e:2x2
jax: 0.10.0
libtpu: 0.0.40
codegen_flags: <defaults>
</compile_context>

<pallas_src>
import jax
import jax.numpy as jnp
from jax.experimental import pallas as pl
from jax.experimental.pallas import tpu as pltpu

# ---------------- model hyper-parameters (small, consistent with module) ----
OUTPUT_DIM = 16      # vocab size
EMB_DIM    = 32
N_HEAD     = 4
HEAD       = EMB_DIM // N_HEAD
FF_HIDDEN  = 4 * EMB_DIM
N_LAYERS   = 2
HID_DIM    = 64      # stored but unused in forward (matches PyTorch module)
B, T, S    = 2, 8, 8 # batch, decoder seq len, encoder seq len
LN_EPS     = 1e-5
NEG_INF    = -1e30
LANE       = 128     # lane-dense padding target

# ---- packed-slab column / row layout (all static Python ints) ---------------
SA_QKV_C = 0                      # [wq | wk | wv]  (E, 3E)
SA_PW_C  = 3 * EMB_DIM            # (E, E)
CA_QKV_C = 4 * EMB_DIM            # [wq | wk | wv]  (E, 3E)
CA_PW_C  = 7 * EMB_DIM            # (E, E)
FF_W1_C  = 8 * EMB_DIM            # (E, FF_HIDDEN)
FC_W_C   = FF_W1_C + FF_HIDDEN    # (E, LANE)  vocab padded to 128
WMAT_COLS = FC_W_C + LANE

R_LN1_G, R_LN1_B, R_LN2_G, R_LN2_B, R_LN3_G, R_LN3_B = 0, 1, 2, 3, 4, 5
R_SA_PB, R_CA_PB, R_FF_B2, R_FF_B1, R_FC_B = 6, 7, 8, 9, 10
VEC_ROWS = 11


# --------------------------- fused Pallas kernel -----------------------------
def fused_decoder_kernel(ids_ref, enc_ref, emb_ref, wmat_ref, ffw2_ref, vec_ref,
                         out_ref):
    """Embedding + last decoder layer + fc_out for the full batch, all in VMEM."""
    n = ids_ref.shape[0]               # B*T
    bsz, s_len, e = enc_ref.shape
    t = n // bsz
    v = emb_ref.shape[0]

    wmat = wmat_ref[...]               # (E, 512) lane-dense weight slab
    vec = vec_ref[...]                 # (11, 128) LN / bias slab

    # ---- embedding lookup: one-hot(ids) @ table (dropout is identity) -------
    ids = ids_ref[...]                                            # (n, 1) int32
    col = jax.lax.broadcasted_iota(jnp.int32, (n, v), 1)
    onehot = (col == ids).astype(jnp.float32)                     # (n, V)
    dec = jnp.dot(onehot, emb_ref[...],
                  preferred_element_type=jnp.float32)             # (n, E)

    enc = enc_ref[...].reshape(bsz * s_len, e)                    # (B*S, E)

    def layernorm(x, g_row, b_row):
        mu = jnp.mean(x, axis=-1, keepdims=True)
        xc = x - mu
        var = jnp.mean(xc * xc, axis=-1, keepdims=True)
        return (xc * jax.lax.rsqrt(var + LN_EPS)
                * vec[g_row:g_row + 1, :e] + vec[b_row:b_row + 1, :e])

    def mha(q_in, kv_in, tq, tk, qkv_col, proj_col, pb_row, causal):
        # q_in: (B*tq, E), kv_in: (B*tk, E)
        wq  = wmat[:, qkv_col:qkv_col + e]                        # (E, E)
        wkv = wmat[:, qkv_col + e:qkv_col + 3 * e]                # (E, 2E)
        pw  = wmat[:, proj_col:proj_col + e]                      # (E, E)

        # full-width projections (single MXU passes, no per-head matmuls)
        q   = jnp.dot(q_in,  wq,  preferred_element_type=jnp.float32)   # (B*tq, E)
        kvp = jnp.dot(kv_in, wkv, preferred_element_type=jnp.float32)   # (B*tk, 2E)

        scale = 1.0 / (HEAD ** 0.5)
        if causal:                                                # built once per call
            ri = jax.lax.broadcasted_iota(jnp.int32, (tq, tk), 0)
            ci = jax.lax.broadcasted_iota(jnp.int32, (tq, tk), 1)
            amask = jnp.where(ri >= ci, 0.0, NEG_INF)

        # Score/softmax/PV are intrinsically head_dim(=8)-wide; keep a tiny
        # static head loop on lane slices (relayout-free, MXU-neutral here).
        heads = []
        for h in range(N_HEAD):
            lo = h * HEAD
            qh = q[:,   lo:lo + HEAD].reshape(bsz, tq, HEAD)
            kh = kvp[:, lo:lo + HEAD].reshape(bsz, tk, HEAD)
            vh = kvp[:, e + lo:e + lo + HEAD].reshape(bsz, tk, HEAD)
            sc = jnp.einsum('bqd,bkd->bqk', qh, kh,
                            preferred_element_type=jnp.float32) * scale
            if causal:
                sc = sc + amask
            sc = sc - jnp.max(sc, axis=-1, keepdims=True)
            p = jnp.exp(sc)
            p = p / jnp.sum(p, axis=-1, keepdims=True)            # exact divide
            heads.append(jnp.einsum('bqk,bkd->bqd', p, vh,
                                    preferred_element_type=jnp.float32))
        o = jnp.concatenate(heads, axis=-1).reshape(bsz * tq, e)  # (B*tq, E)
        # single output projection instead of per-head accumulation
        return (jnp.dot(o, pw, preferred_element_type=jnp.float32)
                + vec[pb_row:pb_row + 1, :e])

    # dec = dec + self.sa(self.ln1(dec), None)            (causal self-attention)
    x1 = layernorm(dec, R_LN1_G, R_LN1_B)
    dec = dec + mha(x1, x1, t, t, SA_QKV_C, SA_PW_C, R_SA_PB, causal=True)

    # dec = dec + self.enc_dec_a(self.ln2(enc), self.ln1(dec))       (cross attn)
    q_in = layernorm(dec, R_LN1_G, R_LN1_B)      # ln1 applied to the UPDATED dec
    kv_in = layernorm(enc, R_LN2_G, R_LN2_B)
    dec = dec + mha(q_in, kv_in, t, s_len, CA_QKV_C, CA_PW_C, R_CA_PB,
                    causal=False)

    # dec = dec + self.ffwd(self.ln3(dec))
    x3 = layernorm(dec, R_LN3_G, R_LN3_B)
    hid = jnp.maximum(
        jnp.dot(x3, wmat[:, FF_W1_C:FF_W1_C + FF_HIDDEN],
                preferred_element_type=jnp.float32)
        + vec[R_FF_B1:R_FF_B1 + 1, :FF_HIDDEN], 0.0)
    dec = dec + (jnp.dot(hid, ffw2_ref[...],
                         preferred_element_type=jnp.float32)
                 + vec[R_FF_B2:R_FF_B2 + 1, :e])

    # prediction = self.fc_out(dec), vocab dim padded to 128 lanes (lane-dense)
    out_ref[...] = (jnp.dot(dec, wmat[:, FC_W_C:FC_W_C + LANE],
                            preferred_element_type=jnp.float32)
                    + vec[R_FC_B:R_FC_B + 1, :])


# --------------------------- wrappers ----------------------------------------
def pack_params(params):
    """One-time, outside-the-jit packing into lane-dense slabs."""
    lp = params["layers"][-1]   # only the last layer's output is used (see spec)

    def pad128(x):  # (1, n) -> (1, 128)
        return jnp.pad(x, ((0, 0), (0, LANE - x.shape[1])))

    wmat = jnp.concatenate(
        [lp["sa_wq"], lp["sa_wk"], lp["sa_wv"], lp["sa_pw"],
         lp["ca_wq"], lp["ca_wk"], lp["ca_wv"], lp["ca_pw"],
         lp["ff_w1"],
         jnp.pad(params["fc_w"], ((0, 0), (0, LANE - OUTPUT_DIM)))],
        axis=1)                                                # (E, 512)
    assert wmat.shape == (EMB_DIM, WMAT_COLS), wmat.shape

    vec = jnp.concatenate(
        [pad128(lp["ln1_g"]), pad128(lp["ln1_b"]),
         pad128(lp["ln2_g"]), pad128(lp["ln2_b"]),
         pad128(lp["ln3_g"]), pad128(lp["ln3_b"]),
         pad128(lp["sa_pb"]), pad128(lp["ca_pb"]),
         pad128(lp["ff_b2"]), pad128(lp["ff_b1"]),
         pad128(params["fc_b"])], axis=0)                      # (11, 128)
    assert vec.shape == (VEC_ROWS, LANE), vec.shape

    return {"emb": params["embedding"].astype(jnp.float32),
            "wmat": wmat.astype(jnp.float32),
            "ffw2": lp["ff_w2"].astype(jnp.float32),
            "vec": vec.astype(jnp.float32)}


@jax.jit
def decoder_forward(packed, input_ids, enc_src):
    if input_ids.ndim == 1:
        input_ids = input_ids[None, :]
    bsz, t = input_ids.shape
    ids2 = input_ids.reshape(bsz * t, 1).astype(jnp.int32)
    enc = enc_src.astype(jnp.float32)

    vmem = pl.BlockSpec(memory_space=pltpu.MemorySpace.VMEM)
    out = pl.pallas_call(
        fused_decoder_kernel,
        out_shape=jax.ShapeDtypeStruct((bsz * t, LANE), jnp.float32),
        in_specs=[vmem] * 6,
        out_specs=vmem,
    )(ids2, enc, packed["emb"], packed["wmat"], packed["ffw2"], packed["vec"])

    return out[:, :OUTPUT_DIM].reshape(bsz, t, OUTPUT_DIM)


# --------------------------- parameter init ----------------------------------
def init_params(key):
    def nrm(k, shape, scale=0.05):
        return (scale * jax.random.normal(k, shape)).astype(jnp.float32)

    keys = jax.random.split(key, 4 + N_LAYERS)
    params = {
        "embedding": nrm(keys[0], (OUTPUT_DIM, EMB_DIM)),
        "fc_w": nrm(keys[1], (EMB_DIM, OUTPUT_DIM)),
        "fc_b": nrm(keys[2], (1, OUTPUT_DIM)),
        "layers": [],
    }
    for li in range(N_LAYERS):
        lk = jax.random.split(keys[4 + li], 16)
        lp = {
            "ln1_g": jnp.ones((1, EMB_DIM), jnp.float32),
            "ln1_b": jnp.zeros((1, EMB_DIM), jnp.float32),
            "ln2_g": jnp.ones((1, EMB_DIM), jnp.float32),
            "ln2_b": jnp.zeros((1, EMB_DIM), jnp.float32),
            "ln3_g": jnp.ones((1, EMB_DIM), jnp.float32),
            "ln3_b": jnp.zeros((1, EMB_DIM), jnp.float32),
            # self-attention: per-head q/k/v linears concatenated column-wise
            "sa_wq": nrm(lk[0], (EMB_DIM, EMB_DIM)),
            "sa_wk": nrm(lk[1], (EMB_DIM, EMB_DIM)),
            "sa_wv": nrm(lk[2], (EMB_DIM, EMB_DIM)),
            "sa_pw": nrm(lk[3], (EMB_DIM, EMB_DIM)),
            "sa_pb": nrm(lk[4], (1, EMB_DIM)),
            # encoder-decoder cross attention
            "ca_wq": nrm(lk[5], (EMB_DIM, EMB_DIM)),
            "ca_wk": nrm(lk[6], (EMB_DIM, EMB_DIM)),
            "ca_wv": nrm(lk[7], (EMB_DIM, EMB_DIM)),
            "ca_pw": nrm(lk[8], (EMB_DIM, EMB_DIM)),
            "ca_pb": nrm(lk[9], (1, EMB_DIM)),
            # feed-forward: Linear(E, 4E) -> ReLU -> Linear(4E, E)
            "ff_w1": nrm(lk[10], (EMB_DIM, FF_HIDDEN)),
            "ff_b1": nrm(lk[11], (1, FF_HIDDEN)),
            "ff_w2": nrm(lk[12], (FF_HIDDEN, EMB_DIM)),
            "ff_b2": nrm(lk[13], (1, EMB_DIM)),
        }
        params["layers"].append(lp)
    return params


# ------------------------------- main -----------------------------------------
if __name__ == "__main__":
    key = jax.random.PRNGKey(0)
    k_par, k_ids, k_enc = jax.random.split(key, 3)

    params = init_params(k_par)
    packed = pack_params(params)        # pack ONCE, outside the jitted forward

    input_ids = jax.random.randint(k_ids, (B, T), 0, OUTPUT_DIM, dtype=jnp.int32)
    enc_src = jax.random.normal(k_enc, (B, S, EMB_DIM), dtype=jnp.float32)

    prediction = decoder_forward(packed, input_ids, enc_src)
    jax.block_until_ready(prediction)

    assert prediction.shape == (B, T, OUTPUT_DIM), prediction.shape
    assert bool(jnp.all(jnp.isfinite(prediction)))
    print("KERNEL_OK")
</pallas_src>

<mosaic_0001>
module attributes {stable_mosaic.version = 11 : i64} {
  func.func @fused_decoder_kernel(%arg0: memref<16x1xi32, #tpu.memory_space<vmem>>, %arg1: memref<2x8x32xf32, #tpu.memory_space<vmem>>, %arg2: memref<16x32xf32, #tpu.memory_space<vmem>>, %arg3: memref<32x512xf32, #tpu.memory_space<vmem>>, %arg4: memref<128x32xf32, #tpu.memory_space<vmem>>, %arg5: memref<11x128xf32, #tpu.memory_space<vmem>>, %arg6: memref<16x128xf32, #tpu.memory_space<vmem>>) attributes {dimension_semantics = [], scalar_prefetch = 0 : i64, scratch_operands = 0 : i64, tpu.core_type = #tpu.core_type<tc>} {
    %c0 = arith.constant 0 : index
    %c0_0 = arith.constant 0 : index
    %0 = vector.load %arg3[%c0, %c0_0] : memref<32x512xf32, #tpu.memory_space<vmem>>, vector<32x512xf32>
    %c0_1 = arith.constant 0 : index
    %c0_2 = arith.constant 0 : index
    %1 = vector.load %arg5[%c0_1, %c0_2] : memref<11x128xf32, #tpu.memory_space<vmem>>, vector<11x128xf32>
    %c0_3 = arith.constant 0 : index
    %c0_4 = arith.constant 0 : index
    %2 = vector.load %arg0[%c0_3, %c0_4] : memref<16x1xi32, #tpu.memory_space<vmem>>, vector<16x1xi32>
    %3 = tpu.iota {dimensions = array<i32: 1>} : vector<16x16xi32>
    %4 = vector.broadcast %2 : vector<16x1xi32> to vector<16x16xi32>
    %5 = arith.cmpi eq, %3, %4 : vector<16x16xi32>
    %6 = arith.extui %5 : vector<16x16xi1> to vector<16x16xi32>
    %7 = arith.sitofp %6 : vector<16x16xi32> to vector<16x16xf32>
    %c0_5 = arith.constant 0 : index
    %c0_6 = arith.constant 0 : index
    %8 = vector.load %arg2[%c0_5, %c0_6] : memref<16x32xf32, #tpu.memory_space<vmem>>, vector<16x32xf32>
    %cst = arith.constant dense<0.000000e+00> : vector<16x32xf32>
    %9 = tpu.matmul %7, %8, %cst {dimension_numbers = #tpu.dot_dimension_numbers<[1], [0], [0], [1], [0, 0, 1, 1], [], []>} : vector<16x16xf32>, vector<16x32xf32>, vector<16x32xf32> -> vector<16x32xf32>
    %c0_7 = arith.constant 0 : index
    %c0_8 = arith.constant 0 : index
    %c0_9 = arith.constant 0 : index
    %10 = vector.load %arg1[%c0_7, %c0_8, %c0_9] : memref<2x8x32xf32, #tpu.memory_space<vmem>>, vector<2x8x32xf32>
    %11 = vector.shape_cast %10 : vector<2x8x32xf32> to vector<16x32xf32>
    %cst_10 = arith.constant dense<0.000000e+00> : vector<16xf32>
    %12 = vector.multi_reduction <add>, %9, %cst_10 [1] : vector<16x32xf32> to vector<16xf32>
    %13 = vector.shape_cast %12 : vector<16xf32> to vector<16x1xf32>
    %cst_11 = arith.constant 3.200000e+01 : f32
    %14 = vector.broadcast %cst_11 : f32 to vector<16x1xf32>
    %15 = arith.divf %13, %14 : vector<16x1xf32>
    %16 = vector.broadcast %15 : vector<16x1xf32> to vector<16x32xf32>
    %17 = arith.subf %9, %16 : vector<16x32xf32>
    %18 = arith.mulf %17, %17 : vector<16x32xf32>
    %cst_12 = arith.constant dense<0.000000e+00> : vector<16xf32>
    %19 = vector.multi_reduction <add>, %18, %cst_12 [1] : vector<16x32xf32> to vector<16xf32>
    %20 = vector.shape_cast %19 : vector<16xf32> to vector<16x1xf32>
    %cst_13 = arith.constant 3.200000e+01 : f32
    %21 = vector.broadcast %cst_13 : f32 to vector<16x1xf32>
    %22 = arith.divf %20, %21 : vector<16x1xf32>
    %cst_14 = arith.constant 9.99999974E-6 : f32
    %23 = vector.broadcast %cst_14 : f32 to vector<16x1xf32>
    %24 = arith.addf %22, %23 : vector<16x1xf32>
    %25 = math.rsqrt %24 : vector<16x1xf32>
    %26 = vector.broadcast %25 : vector<16x1xf32> to vector<16x32xf32>
    %27 = arith.mulf %17, %26 : vector<16x32xf32>
    %28 = vector.extract_strided_slice %1 {offsets = [0, 0], sizes = [1, 32], strides = [1, 1]} : vector<11x128xf32> to vector<1x32xf32>
    %29 = vector.broadcast %28 : vector<1x32xf32> to vector<16x32xf32>
    %30 = arith.mulf %27, %29 : vector<16x32xf32>
    %31 = vector.extract_strided_slice %1 {offsets = [1, 0], sizes = [1, 32], strides = [1, 1]} : vector<11x128xf32> to vector<1x32xf32>
    %32 = vector.broadcast %31 : vector<1x32xf32> to vector<16x32xf32>
    %33 = arith.addf %30, %32 : vector<16x32xf32>
    %34 = vector.extract_strided_slice %0 {offsets = [0, 0], sizes = [32, 32], strides = [1, 1]} : vector<32x512xf32> to vector<32x32xf32>
    %35 = vector.extract_strided_slice %0 {offsets = [0, 32], sizes = [32, 64], strides = [1, 1]} : vector<32x512xf32> to vector<32x64xf32>
    %36 = vector.extract_strided_slice %0 {offsets = [0, 96], sizes = [32, 32], strides = [1, 1]} : vector<32x512xf32> to vector<32x32xf32>
    %cst_15 = arith.constant dense<0.000000e+00> : vector<16x32xf32>
    %37 = tpu.matmul %33, %34, %cst_15 {dimension_numbers = #tpu.dot_dimension_numbers<[1], [0], [0], [1], [0, 0, 1, 1], [], []>} : vector<16x32xf32>, vector<32x32xf32>, vector<16x32xf32> -> vector<16x32xf32>
    %cst_16 = arith.constant dense<0.000000e+00> : vector<16x64xf32>
    %38 = tpu.matmul %33, %35, %cst_16 {dimension_numbers = #tpu.dot_dimension_numbers<[1], [0], [0], [1], [0, 0, 1, 1], [], []>} : vector<16x32xf32>, vector<32x64xf32>, vector<16x64xf32> -> vector<16x64xf32>
    %39 = tpu.iota {dimensions = array<i32: 0>} : vector<8x8xi32>
    %40 = tpu.iota {dimensions = array<i32: 1>} : vector<8x8xi32>
    %41 = arith.cmpi sge, %39, %40 : vector<8x8xi32>
    %cst_17 = arith.constant 0.000000e+00 : f32
    %cst_18 = arith.constant -1.000000e+30 : f32
    %42 = vector.broadcast %cst_17 : f32 to vector<8x8xf32>
    %43 = vector.broadcast %cst_18 : f32 to vector<8x8xf32>
    %44 = arith.select %41, %42, %43 : vector<8x8xi1>, vector<8x8xf32>
    %45 = vector.extract_strided_slice %37 {offsets = [0, 0], sizes = [16, 8], strides = [1, 1]} : vector<16x32xf32> to vector<16x8xf32>
    %46 = vector.shape_cast %45 : vector<16x8xf32> to vector<2x8x8xf32>
    %47 = vector.extract_strided_slice %38 {offsets = [0, 0], sizes = [16, 8], strides = [1, 1]} : vector<16x64xf32> to vector<16x8xf32>
    %48 = vector.shape_cast %47 : vector<16x8xf32> to vector<2x8x8xf32>
    %49 = vector.extract_strided_slice %38 {offsets = [0, 32], sizes = [16, 8], strides = [1, 1]} : vector<16x64xf32> to vector<16x8xf32>
    %50 = vector.shape_cast %49 : vector<16x8xf32> to vector<2x8x8xf32>
    "tpu.trace_start"() <{level = 10 : i32, message = "bqd,bkd->bqk"}> : () -> ()
    %cst_19 = arith.constant dense<0.000000e+00> : vector<2x8x8xf32>
    %51 = tpu.matmul %46, %48, %cst_19 {dimension_numbers = #tpu.dot_dimension_numbers<[2], [2], [1], [1], [0, 0, 0, 1, 1, 1], [0], [0]>} : vector<2x8x8xf32>, vector<2x8x8xf32>, vector<2x8x8xf32> -> vector<2x8x8xf32>
    "tpu.trace_stop"() : () -> ()
    %cst_20 = arith.constant 0.353553385 : f32
    %52 = vector.broadcast %cst_20 : f32 to vector<2x8x8xf32>
    %53 = arith.mulf %51, %52 : vector<2x8x8xf32>
    %54 = vector.shape_cast %44 : vector<8x8xf32> to vector<1x8x8xf32>
    %55 = vector.broadcast %54 : vector<1x8x8xf32> to vector<2x8x8xf32>
    %56 = arith.addf %53, %55 : vector<2x8x8xf32>
    %cst_21 = arith.constant dense<0xFF800000> : vector<2x8xf32>
    %57 = vector.multi_reduction <maximumf>, %56, %cst_21 [2] : vector<2x8x8xf32> to vector<2x8xf32>
    %58 = vector.shape_cast %57 : vector<2x8xf32> to vector<2x8x1xf32>
    %59 = vector.broadcast %58 : vector<2x8x1xf32> to vector<2x8x8xf32>
    %60 = arith.subf %56, %59 : vector<2x8x8xf32>
    %61 = math.exp %60 : vector<2x8x8xf32>
    %cst_22 = arith.constant dense<0.000000e+00> : vector<2x8xf32>
    %62 = vector.multi_reduction <add>, %61, %cst_22 [2] : vector<2x8x8xf32> to vector<2x8xf32>
    %63 = vector.shape_cast %62 : vector<2x8xf32> to vector<2x8x1xf32>
    %64 = vector.broadcast %63 : vector<2x8x1xf32> to vector<2x8x8xf32>
    %65 = arith.divf %61, %64 : vector<2x8x8xf32>
    "tpu.trace_start"() <{level = 10 : i32, message = "bqk,bkd->bqd"}> : () -> ()
    %cst_23 = arith.constant dense<0.000000e+00> : vector<2x8x8xf32>
    %66 = tpu.matmul %65, %50, %cst_23 {dimension_numbers = #tpu.dot_dimension_numbers<[2], [1], [1], [2], [0, 0, 0, 1, 1, 2], [0], [0]>} : vector<2x8x8xf32>, vector<2x8x8xf32>, vector<2x8x8xf32> -> vector<2x8x8xf32>
    "tpu.trace_stop"() : () -> ()
    %67 = vector.extract_strided_slice %37 {offsets = [0, 8], sizes = [16, 8], strides = [1, 1]} : vector<16x32xf32> to vector<16x8xf32>
    %68 = vector.shape_cast %67 : vector<16x8xf32> to vector<2x8x8xf32>
    %69 = vector.extract_strided_slice %38 {offsets = [0, 8], sizes = [16, 8], strides = [1, 1]} : vector<16x64xf32> to vector<16x8xf32>
    %70 = vector.shape_cast %69 : vector<16x8xf32> to vector<2x8x8xf32>
    %71 = vector.extract_strided_slice %38 {offsets = [0, 40], sizes = [16, 8], strides = [1, 1]} : vector<16x64xf32> to vector<16x8xf32>
    %72 = vector.shape_cast %71 : vector<16x8xf32> to vector<2x8x8xf32>
    "tpu.trace_start"() <{level = 10 : i32, message = "bqd,bkd->bqk"}> : () -> ()
    %cst_24 = arith.constant dense<0.000000e+00> : vector<2x8x8xf32>
    %73 = tpu.matmul %68, %70, %cst_24 {dimension_numbers = #tpu.dot_dimension_numbers<[2], [2], [1], [1], [0, 0, 0, 1, 1, 1], [0], [0]>} : vector<2x8x8xf32>, vector<2x8x8xf32>, vector<2x8x8xf32> -> vector<2x8x8xf32>
    "tpu.trace_stop"() : () -> ()
    %cst_25 = arith.constant 0.353553385 : f32
    %74 = vector.broadcast %cst_25 : f32 to vector<2x8x8xf32>
    %75 = arith.mulf %73, %74 : vector<2x8x8xf32>
    %76 = vector.shape_cast %44 : vector<8x8xf32> to vector<1x8x8xf32>
    %77 = vector.broadcast %76 : vector<1x8x8xf32> to vector<2x8x8xf32>
    %78 = arith.addf %75, %77 : vector<2x8x8xf32>
    %cst_26 = arith.constant dense<0xFF800000> : vector<2x8xf32>
    %79 = vector.multi_reduction <maximumf>, %78, %cst_26 [2] : vector<2x8x8xf32> to vector<2x8xf32>
    %80 = vector.shape_cast %79 : vector<2x8xf32> to vector<2x8x1xf32>
    %81 = vector.broadcast %80 : vector<2x8x1xf32> to vector<2x8x8xf32>
    %82 = arith.subf %78, %81 : vector<2x8x8xf32>
    %83 = math.exp %82 : vector<2x8x8xf32>
    %cst_27 = arith.constant dense<0.000000e+00> : vector<2x8xf32>
    %84 = vector.multi_reduction <add>, %83, %cst_27 [2] : vector<2x8x8xf32> to vector<2x8xf32>
    %85 = vector.shape_cast %84 : vector<2x8xf32> to vector<2x8x1xf32>
    %86 = vector.broadcast %85 : vector<2x8x1xf32> to vector<2x8x8xf32>
    %87 = arith.divf %83, %86 : vector<2x8x8xf32>
    "tpu.trace_start"() <{level = 10 : i32, message = "bqk,bkd->bqd"}> : () -> ()
    %cst_28 = arith.constant dense<0.000000e+00> : vector<2x8x8xf32>
    %88 = tpu.matmul %87, %72, %cst_28 {dimension_numbers = #tpu.dot_dimension_numbers<[2], [1], [1], [2], [0, 0, 0, 1, 1, 2], [0], [0]>} : vector<2x8x8xf32>, vector<2x8x8xf32>, vector<2x8x8xf32> -> vector<2x8x8xf32>
    "tpu.trace_stop"() : () -> ()
    %89 = vector.extract_strided_slice %37 {offsets = [0, 16], sizes = [16, 8], strides = [1, 1]} : vector<16x32xf32> to vector<16x8xf32>
    %90 = vector.shape_cast %89 : vector<16x8xf32> to vector<2x8x8xf32>
    %91 = vector.extract_strided_slice %38 {offsets = [0, 16], sizes = [16, 8], strides = [1, 1]} : vector<16x64xf32> to vector<16x8xf32>
    %92 = vector.shape_cast %91 : vector<16x8xf32> to vector<2x8x8xf32>
    %93 = vector.extract_strided_slice %38 {offsets = [0, 48], sizes = [16, 8], strides = [1, 1]} : vector<16x64xf32> to vector<16x8xf32>
    %94 = vector.shape_cast %93 : vector<16x8xf32> to vector<2x8x8xf32>
    "tpu.trace_start"() <{level = 10 : i32, message = "bqd,bkd->bqk"}> : () -> ()
    %cst_29 = arith.constant dense<0.000000e+00> : vector<2x8x8xf32>
    %95 = tpu.matmul %90, %92, %cst_29 {dimension_numbers = #tpu.dot_dimension_numbers<[2], [2], [1], [1], [0, 0, 0, 1, 1, 1], [0], [0]>} : vector<2x8x8xf32>, vector<2x8x8xf32>, vector<2x8x8xf32> -> vector<2x8x8xf32>
    "tpu.trace_stop"() : () -> ()
    %cst_30 = arith.constant 0.353553385 : f32
    %96 = vector.broadcast %cst_30 : f32 to vector<2x8x8xf32>
    %97 = arith.mulf %95, %96 : vector<2x8x8xf32>
    %98 = vector.shape_cast %44 : vector<8x8xf32> to vector<1x8x8xf32>
    %99 = vector.broadcast %98 : vector<1x8x8xf32> to vector<2x8x8xf32>
    %100 = arith.addf %97, %99 : vector<2x8x8xf32>
    %cst_31 = arith.constant dense<0xFF800000> : vector<2x8xf32>
    %101 = vector.multi_reduction <maximumf>, %100, %cst_31 [2] : vector<2x8x8xf32> to vector<2x8xf32>
    %102 = vector.shape_cast %101 : vector<2x8xf32> to vector<2x8x1xf32>
    %103 = vector.broadcast %102 : vector<2x8x1xf32> to vector<2x8x8xf32>
    %104 = arith.subf %100, %103 : vector<2x8x8xf32>
    %105 = math.exp %104 : vector<2x8x8xf32>
    %cst_32 = arith.constant dense<0.000000e+00> : vector<2x8xf32>
    %106 = vector.multi_reduction <add>, %105, %cst_32 [2] : vector<2x8x8xf32> to vector<2x8xf32>
    %107 = vector.shape_cast %106 : vector<2x8xf32> to vector<2x8x1xf32>
    %108 = vector.broadcast %107 : vector<2x8x1xf32> to vector<2x8x8xf32>
    %109 = arith.divf %105, %108 : vector<2x8x8xf32>
    "tpu.trace_start"() <{level = 10 : i32, message = "bqk,bkd->bqd"}> : () -> ()
    %cst_33 = arith.constant dense<0.000000e+00> : vector<2x8x8xf32>
    %110 = tpu.matmul %109, %94, %cst_33 {dimension_numbers = #tpu.dot_dimension_numbers<[2], [1], [1], [2], [0, 0, 0, 1, 1, 2], [0], [0]>} : vector<2x8x8xf32>, vector<2x8x8xf32>, vector<2x8x8xf32> -> vector<2x8x8xf32>
    "tpu.trace_stop"() : () -> ()
    %111 = vector.extract_strided_slice %37 {offsets = [0, 24], sizes = [16, 8], strides = [1, 1]} : vector<16x32xf32> to vector<16x8xf32>
    %112 = vector.shape_cast %111 : vector<16x8xf32> to vector<2x8x8xf32>
    %113 = vector.extract_strided_slice %38 {offsets = [0, 24], sizes = [16, 8], strides = [1, 1]} : vector<16x64xf32> to vector<16x8xf32>
    %114 = vector.shape_cast %113 : vector<16x8xf32> to vector<2x8x8xf32>
    %115 = vector.extract_strided_slice %38 {offsets = [0, 56], sizes = [16, 8], strides = [1, 1]} : vector<16x64xf32> to vector<16x8xf32>
    %116 = vector.shape_cast %115 : vector<16x8xf32> to vector<2x8x8xf32>
    "tpu.trace_start"() <{level = 10 : i32, message = "bqd,bkd->bqk"}> : () -> ()
    %cst_34 = arith.constant dense<0.000000e+00> : vector<2x8x8xf32>
    %117 = tpu.matmul %112, %114, %cst_34 {dimension_numbers = #tpu.dot_dimension_numbers<[2], [2], [1], [1], [0, 0, 0, 1, 1, 1], [0], [0]>} : vector<2x8x8xf32>, vector<2x8x8xf32>, vector<2x8x8xf32> -> vector<2x8x8xf32>
    "tpu.trace_stop"() : () -> ()
    %cst_35 = arith.constant 0.353553385 : f32
    %118 = vector.broadcast %cst_35 : f32 to vector<2x8x8xf32>
    %119 = arith.mulf %117, %118 : vector<2x8x8xf32>
    %120 = vector.shape_cast %44 : vector<8x8xf32> to vector<1x8x8xf32>
    %121 = vector.broadcast %120 : vector<1x8x8xf32> to vector<2x8x8xf32>
    %122 = arith.addf %119, %121 : vector<2x8x8xf32>
    %cst_36 = arith.constant dense<0xFF800000> : vector<2x8xf32>
    %123 = vector.multi_reduction <maximumf>, %122, %cst_36 [2] : vector<2x8x8xf32> to vector<2x8xf32>
    %124 = vector.shape_cast %123 : vector<2x8xf32> to vector<2x8x1xf32>
    %125 = vector.broadcast %124 : vector<2x8x1xf32> to vector<2x8x8xf32>
    %126 = arith.subf %122, %125 : vector<2x8x8xf32>
    %127 = math.exp %126 : vector<2x8x8xf32>
    %cst_37 = arith.constant dense<0.000000e+00> : vector<2x8xf32>
    %128 = vector.multi_reduction <add>, %127, %cst_37 [2] : vector<2x8x8xf32> to vector<2x8xf32>
    %129 = vector.shape_cast %128 : vector<2x8xf32> to vector<2x8x1xf32>
    %130 = vector.broadcast %129 : vector<2x8x1xf32> to vector<2x8x8xf32>
    %131 = arith.divf %127, %130 : vector<2x8x8xf32>
    "tpu.trace_start"() <{level = 10 : i32, message = "bqk,bkd->bqd"}> : () -> ()
    %cst_38 = arith.constant dense<0.000000e+00> : vector<2x8x8xf32>
    %132 = tpu.matmul %131, %116, %cst_38 {dimension_numbers = #tpu.dot_dimension_numbers<[2], [1], [1], [2], [0, 0, 0, 1, 1, 2], [0], [0]>} : vector<2x8x8xf32>, vector<2x8x8xf32>, vector<2x8x8xf32> -> vector<2x8x8xf32>
    "tpu.trace_stop"() : () -> ()
    %133 = tpu.concatenate %66, %88, %110, %132 in 2 : vector<2x8x8xf32>, vector<2x8x8xf32>, vector<2x8x8xf32>, vector<2x8x8xf32> -> vector<2x8x32xf32>
    %134 = vector.shape_cast %133 : vector<2x8x32xf32> to vector<16x32xf32>
    %cst_39 = arith.constant dense<0.000000e+00> : vector<16x32xf32>
    %135 = tpu.matmul %134, %36, %cst_39 {dimension_numbers = #tpu.dot_dimension_numbers<[1], [0], [0], [1], [0, 0, 1, 1], [], []>} : vector<16x32xf32>, vector<32x32xf32>, vector<16x32xf32> -> vector<16x32xf32>
    %136 = vector.extract_strided_slice %1 {offsets = [6, 0], sizes = [1, 32], strides = [1, 1]} : vector<11x128xf32> to vector<1x32xf32>
    %137 = vector.broadcast %136 : vector<1x32xf32> to vector<16x32xf32>
    %138 = arith.addf %135, %137 : vector<16x32xf32>
    %139 = arith.addf %9, %138 : vector<16x32xf32>
    %cst_40 = arith.constant dense<0.000000e+00> : vector<16xf32>
    %140 = vector.multi_reduction <add>, %139, %cst_40 [1] : vector<16x32xf32> to vector<16xf32>
    %141 = vector.shape_cast %140 : vector<16xf32> to vector<16x1xf32>
    %cst_41 = arith.constant 3.200000e+01 : f32
    %142 = vector.broadcast %cst_41 : f32 to vector<16x1xf32>
    %143 = arith.divf %141, %142 : vector<16x1xf32>
    %144 = vector.broadcast %143 : vector<16x1xf32> to vector<16x32xf32>
    %145 = arith.subf %139, %144 : vector<16x32xf32>
    %146 = arith.mulf %145, %145 : vector<16x32xf32>
    %cst_42 = arith.constant dense<0.000000e+00> : vector<16xf32>
    %147 = vector.multi_reduction <add>, %146, %cst_42 [1] : vector<16x32xf32> to vector<16xf32>
    %148 = vector.shape_cast %147 : vector<16xf32> to vector<16x1xf32>
    %cst_43 = arith.constant 3.200000e+01 : f32
    %149 = vector.broadcast %cst_43 : f32 to vector<16x1xf32>
    %150 = arith.divf %148, %149 : vector<16x1xf32>
    %cst_44 = arith.constant 9.99999974E-6 : f32
    %151 = vector.broadcast %cst_44 : f32 to vector<16x1xf32>
    %152 = arith.addf %150, %151 : vector<16x1xf32>
    %153 = math.rsqrt %152 : vector<16x1xf32>
    %154 = vector.broadcast %153 : vector<16x1xf32> to vector<16x32xf32>
    %155 = arith.mulf %145, %154 : vector<16x32xf32>
    %156 = vector.extract_strided_slice %1 {offsets = [0, 0], sizes = [1, 32], strides = [1, 1]} : vector<11x128xf32> to vector<1x32xf32>
    %157 = vector.broadcast %156 : vector<1x32xf32> to vector<16x32xf32>
    %158 = arith.mulf %155, %157 : vector<16x32xf32>
    %159 = vector.extract_strided_slice %1 {offsets = [1, 0], sizes = [1, 32], strides = [1, 1]} : vector<11x128xf32> to vector<1x32xf32>
    %160 = vector.broadcast %159 : vector<1x32xf32> to vector<16x32xf32>
    %161 = arith.addf %158, %160 : vector<16x32xf32>
    %cst_45 = arith.constant dense<0.000000e+00> : vector<16xf32>
    %162 = vector.multi_reduction <add>, %11, %cst_45 [1] : vector<16x32xf32> to vector<16xf32>
    %163 = vector.shape_cast %162 : vector<16xf32> to vector<16x1xf32>
    %cst_46 = arith.constant 3.200000e+01 : f32
    %164 = vector.broadcast %cst_46 : f32 to vector<16x1xf32>
    %165 = arith.divf %163, %164 : vector<16x1xf32>
    %166 = vector.broadcast %165 : vector<16x1xf32> to vector<16x32xf32>
    %167 = arith.subf %11, %166 : vector<16x32xf32>
    %168 = arith.mulf %167, %167 : vector<16x32xf32>
    %cst_47 = arith.constant dense<0.000000e+00> : vector<16xf32>
    %169 = vector.multi_reduction <add>, %168, %cst_47 [1] : vector<16x32xf32> to vector<16xf32>
    %170 = vector.shape_cast %169 : vector<16xf32> to vector<16x1xf32>
    %cst_48 = arith.constant 3.200000e+01 : f32
    %171 = vector.broadcast %cst_48 : f32 to vector<16x1xf32>
    %172 = arith.divf %170, %171 : vector<16x1xf32>
    %cst_49 = arith.constant 9.99999974E-6 : f32
    %173 = vector.broadcast %cst_49 : f32 to vector<16x1xf32>
    %174 = arith.addf %172, %173 : vector<16x1xf32>
    %175 = math.rsqrt %174 : vector<16x1xf32>
    %176 = vector.broadcast %175 : vector<16x1xf32> to vector<16x32xf32>
    %177 = arith.mulf %167, %176 : vector<16x32xf32>
    %178 = vector.extract_strided_slice %1 {offsets = [2, 0], sizes = [1, 32], strides = [1, 1]} : vector<11x128xf32> to vector<1x32xf32>
    %179 = vector.broadcast %178 : vector<1x32xf32> to vector<16x32xf32>
    %180 = arith.mulf %177, %179 : vector<16x32xf32>
    %181 = vector.extract_strided_slice %1 {offsets = [3, 0], sizes = [1, 32], strides = [1, 1]} : vector<11x128xf32> to vector<1x32xf32>
    %182 = vector.broadcast %181 : vector<1x32xf32> to vector<16x32xf32>
    %183 = arith.addf %180, %182 : vector<16x32xf32>
    %184 = vector.extract_strided_slice %0 {offsets = [0, 128], sizes = [32, 32], strides = [1, 1]} : vector<32x512xf32> to vector<32x32xf32>
    %185 = vector.extract_strided_slice %0 {offsets = [0, 160], sizes = [32, 64], strides = [1, 1]} : vector<32x512xf32> to vector<32x64xf32>
    %186 = vector.extract_strided_slice %0 {offsets = [0, 224], sizes = [32, 32], strides = [1, 1]} : vector<32x512xf32> to vector<32x32xf32>
    %cst_50 = arith.constant dense<0.000000e+00> : vector<16x32xf32>
    %187 = tpu.matmul %161, %184, %cst_50 {dimension_numbers = #tpu.dot_dimension_numbers<[1], [0], [0], [1], [0, 0, 1, 1], [], []>} : vector<16x32xf32>, vector<32x32xf32>, vector<16x32xf32> -> vector<16x32xf32>
    %cst_51 = arith.constant dense<0.000000e+00> : vector<16x64xf32>
    %188 = tpu.matmul %183, %185, %cst_51 {dimension_numbers = #tpu.dot_dimension_numbers<[1], [0], [0], [1], [0, 0, 1, 1], [], []>} : vector<16x32xf32>, vector<32x64xf32>, vector<16x64xf32> -> vector<16x64xf32>
    %189 = vector.extract_strided_slice %187 {offsets = [0, 0], sizes = [16, 8], strides = [1, 1]} : vector<16x32xf32> to vector<16x8xf32>
    %190 = vector.shape_cast %189 : vector<16x8xf32> to vector<2x8x8xf32>
    %191 = vector.extract_strided_slice %188 {offsets = [0, 0], sizes = [16, 8], strides = [1, 1]} : vector<16x64xf32> to vector<16x8xf32>
    %192 = vector.shape_cast %191 : vector<16x8xf32> to vector<2x8x8xf32>
    %193 = vector.extract_strided_slice %188 {offsets = [0, 32], sizes = [16, 8], strides = [1, 1]} : vector<16x64xf32> to vector<16x8xf32>
    %194 = vector.shape_cast %193 : vector<16x8xf32> to vector<2x8x8xf32>
    "tpu.trace_start"() <{level = 10 : i32, message = "bqd,bkd->bqk"}> : () -> ()
    %cst_52 = arith.constant dense<0.000000e+00> : vector<2x8x8xf32>
    %195 = tpu.matmul %190, %192, %cst_52 {dimension_numbers = #tpu.dot_dimension_numbers<[2], [2], [1], [1], [0, 0, 0, 1, 1, 1], [0], [0]>} : vector<2x8x8xf32>, vector<2x8x8xf32>, vector<2x8x8xf32> -> vector<2x8x8xf32>
    "tpu.trace_stop"() : () -> ()
    %cst_53 = arith.constant 0.353553385 : f32
    %196 = vector.broadcast %cst_53 : f32 to vector<2x8x8xf32>
    %197 = arith.mulf %195, %196 : vector<2x8x8xf32>
    %cst_54 = arith.constant dense<0xFF800000> : vector<2x8xf32>
    %198 = vector.multi_reduction <maximumf>, %197, %cst_54 [2] : vector<2x8x8xf32> to vector<2x8xf32>
    %199 = vector.shape_cast %198 : vector<2x8xf32> to vector<2x8x1xf32>
    %200 = vector.broadcast %199 : vector<2x8x1xf32> to vector<2x8x8xf32>
    %201 = arith.subf %197, %200 : vector<2x8x8xf32>
    %202 = math.exp %201 : vector<2x8x8xf32>
    %cst_55 = arith.constant dense<0.000000e+00> : vector<2x8xf32>
    %203 = vector.multi_reduction <add>, %202, %cst_55 [2] : vector<2x8x8xf32> to vector<2x8xf32>
    %204 = vector.shape_cast %203 : vector<2x8xf32> to vector<2x8x1xf32>
    %205 = vector.broadcast %204 : vector<2x8x1xf32> to vector<2x8x8xf32>
    %206 = arith.divf %202, %205 : vector<2x8x8xf32>
    "tpu.trace_start"() <{level = 10 : i32, message = "bqk,bkd->bqd"}> : () -> ()
    %cst_56 = arith.constant dense<0.000000e+00> : vector<2x8x8xf32>
    %207 = tpu.matmul %206, %194, %cst_56 {dimension_numbers = #tpu.dot_dimension_numbers<[2], [1], [1], [2], [0, 0, 0, 1, 1, 2], [0], [0]>} : vector<2x8x8xf32>, vector<2x8x8xf32>, vector<2x8x8xf32> -> vector<2x8x8xf32>
    "tpu.trace_stop"() : () -> ()
    %208 = vector.extract_strided_slice %187 {offsets = [0, 8], sizes = [16, 8], strides = [1, 1]} : vector<16x32xf32> to vector<16x8xf32>
    %209 = vector.shape_cast %208 : vector<16x8xf32> to vector<2x8x8xf32>
    %210 = vector.extract_strided_slice %188 {offsets = [0, 8], sizes = [16, 8], strides = [1, 1]} : vector<16x64xf32> to vector<16x8xf32>
    %211 = vector.shape_cast %210 : vector<16x8xf32> to vector<2x8x8xf32>
    %212 = vector.extract_strided_slice %188 {offsets = [0, 40], sizes = [16, 8], strides = [1, 1]} : vector<16x64xf32> to vector<16x8xf32>
    %213 = vector.shape_cast %212 : vector<16x8xf32> to vector<2x8x8xf32>
    "tpu.trace_start"() <{level = 10 : i32, message = "bqd,bkd->bqk"}> : () -> ()
    %cst_57 = arith.constant dense<0.000000e+00> : vector<2x8x8xf32>
    %214 = tpu.matmul %209, %211, %cst_57 {dimension_numbers = #tpu.dot_dimension_numbers<[2], [2], [1], [1], [0, 0, 0, 1, 1, 1], [0], [0]>} : vector<2x8x8xf32>, vector<2x8x8xf32>, vector<2x8x8xf32> -> vector<2x8x8xf32>
    "tpu.trace_stop"() : () -> ()
    %cst_58 = arith.constant 0.353553385 : f32
    %215 = vector.broadcast %cst_58 : f32 to vector<2x8x8xf32>
    %216 = arith.mulf %214, %215 : vector<2x8x8xf32>
    %cst_59 = arith.constant dense<0xFF800000> : vector<2x8xf32>
    %217 = vector.multi_reduction <maximumf>, %216, %cst_59 [2] : vector<2x8x8xf32> to vector<2x8xf32>
    %218 = vector.shape_cast %217 : vector<2x8xf32> to vector<2x8x1xf32>
    %219 = vector.broadcast %218 : vector<2x8x1xf32> to vector<2x8x8xf32>
    %220 = arith.subf %216, %219 : vector<2x8x8xf32>
    %221 = math.exp %220 : vector<2x8x8xf32>
    %cst_60 = arith.constant dense<0.000000e+00> : vector<2x8xf32>
    %222 = vector.multi_reduction <add>, %221, %cst_60 [2] : vector<2x8x8xf32> to vector<2x8xf32>
    %223 = vector.shape_cast %222 : vector<2x8xf32> to vector<2x8x1xf32>
    %224 = vector.broadcast %223 : vector<2x8x1xf32> to vector<2x8x8xf32>
    %225 = arith.divf %221, %224 : vector<2x8x8xf32>
    "tpu.trace_start"() <{level = 10 : i32, message = "bqk,bkd->bqd"}> : () -> ()
    %cst_61 = arith.constant dense<0.000000e+00> : vector<2x8x8xf32>
    %226 = tpu.matmul %225, %213, %cst_61 {dimension_numbers = #tpu.dot_dimension_numbers<[2], [1], [1], [2], [0, 0, 0, 1, 1, 2], [0], [0]>} : vector<2x8x8xf32>, vector<2x8x8xf32>, vector<2x8x8xf32> -> vector<2x8x8xf32>
    "tpu.trace_stop"() : () -> ()
    %227 = vector.extract_strided_slice %187 {offsets = [0, 16], sizes = [16, 8], strides = [1, 1]} : vector<16x32xf32> to vector<16x8xf32>
    %228 = vector.shape_cast %227 : vector<16x8xf32> to vector<2x8x8xf32>
    %229 = vector.extract_strided_slice %188 {offsets = [0, 16], sizes = [16, 8], strides = [1, 1]} : vector<16x64xf32> to vector<16x8xf32>
    %230 = vector.shape_cast %229 : vector<16x8xf32> to vector<2x8x8xf32>
    %231 = vector.extract_strided_slice %188 {offsets = [0, 48], sizes = [16, 8], strides = [1, 1]} : vector<16x64xf32> to vector<16x8xf32>
    %232 = vector.shape_cast %231 : vector<16x8xf32> to vector<2x8x8xf32>
    "tpu.trace_start"() <{level = 10 : i32, message = "bqd,bkd->bqk"}> : () -> ()
    %cst_62 = arith.constant dense<0.000000e+00> : vector<2x8x8xf32>
    %233 = tpu.matmul %228, %230, %cst_62 {dimension_numbers = #tpu.dot_dimension_numbers<[2], [2], [1], [1], [0, 0, 0, 1, 1, 1], [0], [0]>} : vector<2x8x8xf32>, vector<2x8x8xf32>, vector<2x8x8xf32> -> vector<2x8x8xf32>
    "tpu.trace_stop"() : () -> ()
    %cst_63 = arith.constant 0.353553385 : f32
    %234 = vector.broadcast %cst_63 : f32 to vector<2x8x8xf32>
    %235 = arith.mulf %233, %234 : vector<2x8x8xf32>
    %cst_64 = arith.constant dense<0xFF800000> : vector<2x8xf32>
    %236 = vector.multi_reduction <maximumf>, %235, %cst_64 [2] : vector<2x8x8xf32> to vector<2x8xf32>
    %237 = vector.shape_cast %236 : vector<2x8xf32> to vector<2x8x1xf32>
    %238 = vector.broadcast %237 : vector<2x8x1xf32> to vector<2x8x8xf32>
    %239 = arith.subf %235, %238 : vector<2x8x8xf32>
    %240 = math.exp %239 : vector<2x8x8xf32>
    %cst_65 = arith.constant dense<0.000000e+00> : vector<2x8xf32>
    %241 = vector.multi_reduction <add>, %240, %cst_65 [2] : vector<2x8x8xf32> to vector<2x8xf32>
    %242 = vector.shape_cast %241 : vector<2x8xf32> to vector<2x8x1xf32>
    %243 = vector.broadcast %242 : vector<2x8x1xf32> to vector<2x8x8xf32>
    %244 = arith.divf %240, %243 : vector<2x8x8xf32>
    "tpu.trace_start"() <{level = 10 : i32, message = "bqk,bkd->bqd"}> : () -> ()
    %cst_66 = arith.constant dense<0.000000e+00> : vector<2x8x8xf32>
    %245 = tpu.matmul %244, %232, %cst_66 {dimension_numbers = #tpu.dot_dimension_numbers<[2], [1], [1], [2], [0, 0, 0, 1, 1, 2], [0], [0]>} : vector<2x8x8xf32>, vector<2x8x8xf32>, vector<2x8x8xf32> -> vector<2x8x8xf32>
    "tpu.trace_stop"() : () -> ()
    %246 = vector.extract_strided_slice %187 {offsets = [0, 24], sizes = [16, 8], strides = [1, 1]} : vector<16x32xf32> to vector<16x8xf32>
    %247 = vector.shape_cast %246 : vector<16x8xf32> to vector<2x8x8xf32>
    %248 = vector.extract_strided_slice %188 {offsets = [0, 24], sizes = [16, 8], strides = [1, 1]} : vector<16x64xf32> to vector<16x8xf32>
    %249 = vector.shape_cast %248 : vector<16x8xf32> to vector<2x8x8xf32>
    %250 = vector.extract_strided_slice %188 {offsets = [0, 56], sizes = [16, 8], strides = [1, 1]} : vector<16x64xf32> to vector<16x8xf32>
    %251 = vector.shape_cast %250 : vector<16x8xf32> to vector<2x8x8xf32>
    "tpu.trace_start"() <{level = 10 : i32, message = "bqd,bkd->bqk"}> : () -> ()
    %cst_67 = arith.constant dense<0.000000e+00> : vector<2x8x8xf32>
    %252 = tpu.matmul %247, %249, %cst_67 {dimension_numbers = #tpu.dot_dimension_numbers<[2], [2], [1], [1], [0, 0, 0, 1, 1, 1], [0], [0]>} : vector<2x8x8xf32>, vector<2x8x8xf32>, vector<2x8x8xf32> -> vector<2x8x8xf32>
    "tpu.trace_stop"() : () -> ()
    %cst_68 = arith.constant 0.353553385 : f32
    %253 = vector.broadcast %cst_68 : f32 to vector<2x8x8xf32>
    %254 = arith.mulf %252, %253 : vector<2x8x8xf32>
    %cst_69 = arith.constant dense<0xFF800000> : vector<2x8xf32>
    %255 = vector.multi_reduction <maximumf>, %254, %cst_69 [2] : vector<2x8x8xf32> to vector<2x8xf32>
    %256 = vector.shape_cast %255 : vector<2x8xf32> to vector<2x8x1xf32>
    %257 = vector.broadcast %256 : vector<2x8x1xf32> to vector<2x8x8xf32>
    %258 = arith.subf %254, %257 : vector<2x8x8xf32>
    %259 = math.exp %258 : vector<2x8x8xf32>
    %cst_70 = arith.constant dense<0.000000e+00> : vector<2x8xf32>
    %260 = vector.multi_reduction <add>, %259, %cst_70 [2] : vector<2x8x8xf32> to vector<2x8xf32>
    %261 = vector.shape_cast %260 : vector<2x8xf32> to vector<2x8x1xf32>
    %262 = vector.broadcast %261 : vector<2x8x1xf32> to vector<2x8x8xf32>
    %263 = arith.divf %259, %262 : vector<2x8x8xf32>
    "tpu.trace_start"() <{level = 10 : i32, message = "bqk,bkd->bqd"}> : () -> ()
    %cst_71 = arith.constant dense<0.000000e+00> : vector<2x8x8xf32>
    %264 = tpu.matmul %263, %251, %cst_71 {dimension_numbers = #tpu.dot_dimension_numbers<[2], [1], [1], [2], [0, 0, 0, 1, 1, 2], [0], [0]>} : vector<2x8x8xf32>, vector<2x8x8xf32>, vector<2x8x8xf32> -> vector<2x8x8xf32>
    "tpu.trace_stop"() : () -> ()
    %265 = tpu.concatenate %207, %226, %245, %264 in 2 : vector<2x8x8xf32>, vector<2x8x8xf32>, vector<2x8x8xf32>, vector<2x8x8xf32> -> vector<2x8x32xf32>
    %266 = vector.shape_cast %265 : vector<2x8x32xf32> to vector<16x32xf32>
    %cst_72 = arith.constant dense<0.000000e+00> : vector<16x32xf32>
    %267 = tpu.matmul %266, %186, %cst_72 {dimension_numbers = #tpu.dot_dimension_numbers<[1], [0], [0], [1], [0, 0, 1, 1], [], []>} : vector<16x32xf32>, vector<32x32xf32>, vector<16x32xf32> -> vector<16x32xf32>
    %268 = vector.extract_strided_slice %1 {offsets = [7, 0], sizes = [1, 32], strides = [1, 1]} : vector<11x128xf32> to vector<1x32xf32>
    %269 = vector.broadcast %268 : vector<1x32xf32> to vector<16x32xf32>
    %270 = arith.addf %267, %269 : vector<16x32xf32>
    %271 = arith.addf %139, %270 : vector<16x32xf32>
    %cst_73 = arith.constant dense<0.000000e+00> : vector<16xf32>
    %272 = vector.multi_reduction <add>, %271, %cst_73 [1] : vector<16x32xf32> to vector<16xf32>
    %273 = vector.shape_cast %272 : vector<16xf32> to vector<16x1xf32>
    %cst_74 = arith.constant 3.200000e+01 : f32
    %274 = vector.broadcast %cst_74 : f32 to vector<16x1xf32>
    %275 = arith.divf %273, %274 : vector<16x1xf32>
    %276 = vector.broadcast %275 : vector<16x1xf32> to vector<16x32xf32>
    %277 = arith.subf %271, %276 : vector<16x32xf32>
    %278 = arith.mulf %277, %277 : vector<16x32xf32>
    %cst_75 = arith.constant dense<0.000000e+00> : vector<16xf32>
    %279 = vector.multi_reduction <add>, %278, %cst_75 [1] : vector<16x32xf32> to vector<16xf32>
    %280 = vector.shape_cast %279 : vector<16xf32> to vector<16x1xf32>
    %cst_76 = arith.constant 3.200000e+01 : f32
    %281 = vector.broadcast %cst_76 : f32 to vector<16x1xf32>
    %282 = arith.divf %280, %281 : vector<16x1xf32>
    %cst_77 = arith.constant 9.99999974E-6 : f32
    %283 = vector.broadcast %cst_77 : f32 to vector<16x1xf32>
    %284 = arith.addf %282, %283 : vector<16x1xf32>
    %285 = math.rsqrt %284 : vector<16x1xf32>
    %286 = vector.broadcast %285 : vector<16x1xf32> to vector<16x32xf32>
    %287 = arith.mulf %277, %286 : vector<16x32xf32>
    %288 = vector.extract_strided_slice %1 {offsets = [4, 0], sizes = [1, 32], strides = [1, 1]} : vector<11x128xf32> to vector<1x32xf32>
    %289 = vector.broadcast %288 : vector<1x32xf32> to vector<16x32xf32>
    %290 = arith.mulf %287, %289 : vector<16x32xf32>
    %291 = vector.extract_strided_slice %1 {offsets = [5, 0], sizes = [1, 32], strides = [1, 1]} : vector<11x128xf32> to vector<1x32xf32>
    %292 = vector.broadcast %291 : vector<1x32xf32> to vector<16x32xf32>
    %293 = arith.addf %290, %292 : vector<16x32xf32>
    %294 = vector.extract_strided_slice %0 {offsets = [0, 256], sizes = [32, 128], strides = [1, 1]} : vector<32x512xf32> to vector<32x128xf32>
    %cst_78 = arith.constant dense<0.000000e+00> : vector<16x128xf32>
    %295 = tpu.matmul %293, %294, %cst_78 {dimension_numbers = #tpu.dot_dimension_numbers<[1], [0], [0], [1], [0, 0, 1, 1], [], []>} : vector<16x32xf32>, vector<32x128xf32>, vector<16x128xf32> -> vector<16x128xf32>
    %296 = vector.extract_strided_slice %1 {offsets = [9, 0], sizes = [1, 128], strides = [1, 1]} : vector<11x128xf32> to vector<1x128xf32>
    %297 = vector.broadcast %296 : vector<1x128xf32> to vector<16x128xf32>
    %298 = arith.addf %295, %297 : vector<16x128xf32>
    %cst_79 = arith.constant 0.000000e+00 : f32
    %299 = vector.broadcast %cst_79 : f32 to vector<16x128xf32>
    %300 = arith.maximumf %298, %299 : vector<16x128xf32>
    %c0_80 = arith.constant 0 : index
    %c0_81 = arith.constant 0 : index
    %301 = vector.load %arg4[%c0_80, %c0_81] : memref<128x32xf32, #tpu.memory_space<vmem>>, vector<128x32xf32>
    %cst_82 = arith.constant dense<0.000000e+00> : vector<16x32xf32>
    %302 = tpu.matmul %300, %301, %cst_82 {dimension_numbers = #tpu.dot_dimension_numbers<[1], [0], [0], [1], [0, 0, 1, 1], [], []>} : vector<16x128xf32>, vector<128x32xf32>, vector<16x32xf32> -> vector<16x32xf32>
    %303 = vector.extract_strided_slice %1 {offsets = [8, 0], sizes = [1, 32], strides = [1, 1]} : vector<11x128xf32> to vector<1x32xf32>
    %304 = vector.broadcast %303 : vector<1x32xf32> to vector<16x32xf32>
    %305 = arith.addf %302, %304 : vector<16x32xf32>
    %306 = arith.addf %271, %305 : vector<16x32xf32>
    %307 = vector.extract_strided_slice %0 {offsets = [0, 384], sizes = [32, 128], strides = [1, 1]} : vector<32x512xf32> to vector<32x128xf32>
    %cst_83 = arith.constant dense<0.000000e+00> : vector<16x128xf32>
    %308 = tpu.matmul %306, %307, %cst_83 {dimension_numbers = #tpu.dot_dimension_numbers<[1], [0], [0], [1], [0, 0, 1, 1], [], []>} : vector<16x32xf32>, vector<32x128xf32>, vector<16x128xf32> -> vector<16x128xf32>
    %309 = vector.extract_strided_slice %1 {offsets = [10, 0], sizes = [1, 128], strides = [1, 1]} : vector<11x128xf32> to vector<1x128xf32>
    %310 = vector.broadcast %309 : vector<1x128xf32> to vector<16x128xf32>
    %311 = arith.addf %308, %310 : vector<16x128xf32>
    %c0_84 = arith.constant 0 : index
    %c0_85 = arith.constant 0 : index
    %312 = vector.load %arg6[%c0_84, %c0_85] : memref<16x128xf32, #tpu.memory_space<vmem>>, vector<16x128xf32>
    tpu.vector_store %arg6[%c0_84, %c0_85], %311 {strides = array<i32>} : memref<16x128xf32, #tpu.memory_space<vmem>>, vector<16x128xf32>,
    return
  }
}

</mosaic_0001>

<bundles_post_ra>
// kernel: decoder_forward.1
= control target key start
LH: loop header
LB: loop body
LE: loop exit
PB: predicated region body
PF: predicated region fallthrough
CT: control target
= control target key end

     0   :  { %v2216_v0 = vmov 0   ;;  %v43_v5 = vlaneseq  ;;  %vm59_vm0 = vcmask 130048   ;;  %v2217_v8 = vmov 0.0   ;;  %s2219_s11 = smov 96   ;;  %s2220_s14 = smov 120   ;;  %s2913_s0 = inlined_call_operand.vmem [shape: s32[16,1], index: 0, kind: input, shape index: {}]   ;;  %s2914_s2 = inlined_call_operand.vmem [shape: f32[16,32], index: 2, kind: input, shape index: {}]   ;;  %s2915_s3 = inlined_call_operand.vmem [shape: f32[32,512], index: 3, kind: input, shape index: {}]   ;;  %s2916_s5 = inlined_call_operand.vmem [shape: f32[11,128], index: 5, kind: input, shape index: {}]   ;;  %s2917_s1 = inlined_call_operand.vmem [shape: f32[2,8,32], index: 1, kind: input, shape index: {}]   ;;  %s2918_s4 = inlined_call_operand.vmem [shape: f32[128,32], index: 4, kind: input, shape index: {}]   ;;  %s2919_s6 = inlined_call_operand.vmem [shape: f32[16,128], index: 6, kind: output, shape index: {}]  }
   0x1   :  { %2052 = vset.pattern.permute.xlu0 %v2216_v0  ;;  %v41_v1 = vld [vmem:[%s2913_s0] sm:$0xff]  ;;  %v58_v2 = vld [vmem:[%s2914_s2 + $0x8] sm:$0xff]  ;;  %vm91_vm3 = vcmask 261120   ;;  %v2218_v16 = vmov 32.0   ;;  %vm221_vm11 = vcmask 64512   ;;  %s2221_s15 = smov 112  }
   0x2   :  { %46 = vperm.xlu0 %2052, %v41_v1   ;;  %80 = vmatpush.msra.mxu0 %v58_v2  ;;  %v42_v3 = vld [vmem:[%s2913_s0 + $0x8] sm:$0xff]  ;;  %v57_v4 = vld [vmem:[%s2914_s2] sm:$0xff]  ;;  %v2279_v6 = vand.u32 127, %v43_v5  ;;  %2133 = vrcp.f32 %v2218_v16  ;;  %s2222_s16 = smov 104   ;;  %s2224_s17 = smov 72  }
   0x3   :  { %2035 = vmatpush.msra.mxu3 %v58_v2  ;;  %v31_v21 = vld [vmem:[%s2915_s3 + $0x40] sm:$0xff]  ;;  %s2225_s18 = smov 88   ;;  %s2226_s19 = smov 80  }
   0x4   :  { %81 = vmatpush.msra.mxu0 %v57_v4  ;;  %v35_v22 = vld [vmem:[%s2915_s3 + $0x60] sm:$0xff]  ;;  %s2227_s20 = smov 32   ;;  %s2228_s21 = smov 8  }
   0x5   :  { %2036 = vmatpush.msra.mxu3 %v57_v4  ;;  %v23_v23 = vld [vmem:[%s2915_s3] sm:$0xff]  ;;  %v2302_v24 = vpack.i.bf16 %v31_v21, %v35_v22  ;;  %s2229_s22 = smov 16   ;;  %s2230_s23 = smov 24  }
   0x6   :  { %v27_v25 = vld [vmem:[%s2915_s3 + $0x20] sm:$0xff]  ;;  %167 = vmatpush.msrb.mxu0 %v35_v22 }
   0x7   :  { %v2307_v26 = vpack.i.bf16 %v23_v23, %v27_v25  ;;  %v2326_v56 = vld [vmem:[%s2916_s5] sm:$0xff] }
   0x8   :  { %v2134_v17 = vpop.eup %2133  ;;  %168 = vmatpush.msrb.mxu0 %v31_v21  ;;  %v2329_v58 = vperm.slane %v2326_v56, 0  ;;  %v2332_v61 = vperm.slane %v2326_v56, 1 }
   0x9   :  { %v99_v18 = vmul.f32 32.0, %v2134_v17  ;;  %vm103_vm4 = vweird.f32 %v2134_v17 }
   0xa   :  { %49 = vperm.xlu0 %2052, %v42_v3   ;;  %169 = vmatpush.msrb.mxu0 %v27_v25 }
   0xb   :  { %v100_v19 = vsub.f32 1.0, %v99_v18 }
   0xc   :  { %170 = vmatpush.msrb.mxu0 %v23_v23 }
   0xd   :  { %v101_v20 = vmul.f32 %v2134_v17, %v100_v19 }
   0xf   :  { %v102_v27 = vadd.f32 %v2134_v17, %v101_v20 }
  0x11   :  { %v2313_v28 = vsel %vm103_vm4, %v2134_v17, %v102_v27  ;;  %v218_v27 = vshrl.u32 %v43_v5, 7 }
  0x12   :  { %2054 = vrot.lane.b32.xlu0 %v2302_v24, %s2219_s11 }
  0x13   :  { %vm219_vm12 = vcmp.ge.s32.totalorder %v218_v27, %v2279_v6 }
  0x74   :  { %v47_v7 = vpop.permute.xlu0 %46 }
  0x75   :  { %vm51_vm1 = vcmp.eq.s32.totalorder %v2279_v6, %v47_v7 }
  0x76   :  { %v1967_v9 = vsel %vm51_vm1, 1.0, %v2217_v8 }
  0x77   :  { %1969 = vmatmul.msk.f32.vlgmr.msra.gmra.mxu0 %vm59_vm0, %v1967_v9 }
  0x7c   :  { %v50_v10 = vpop.permute.xlu0 %49 }
  0x7d   :  { %vm52_vm2 = vcmp.eq.s32.totalorder %v2279_v6, %v50_v10 }
  0x7e   :  { %v1968_v11 = vsel %vm52_vm2, 1.0, %v2217_v8 }
  0x7f   :  { %1970 = vmatmul.msk.f32.vlgmr.msra.gmra.mxu3 %vm59_vm0, %v1968_v11 }
  0x84   :  { %v2055_v39 = vpop.permute.xlu0 %2054 }
  0x85   :  { %v2056_v40 = vunpack.i.l.bf16 %v2055_v39  ;;  %v2057_v41 = vunpack.i.h.bf16 %v2055_v39 }
  0x87   :  { %206 = vmatpush.msra.mxu2 %v2056_v40 }
  0x89   :  { %207 = vmatpush.msra.mxu2 %v2057_v41 }
  0xf4   :  { %v2285_v12 = vpop.f32.mrf.mxu0 }
  0xf5   :  { %v92_v13 = vsel %vm91_vm3, %v2285_v12, 0.0 }
  0xf6   :  { %93 = vadd.xlane.f32.xlu1 %v92_v13 }
 0x102   :  { %v2289_v14 = vpop.f32.mrf.mxu3 }
 0x103   :  { %v95_v15 = vsel %vm91_vm3, %v2289_v14, 0.0 }
 0x104   :  { %96 = vadd.xlane.f32.xlu1 %v95_v15 }
 0x11d   :  { %2059 = vrot.lane.b32.xlu1 %v2307_v26, %s2219_s11 }
 0x169   :  { %v94_v29 = vpop.xlane.xlu1 %93 }
 0x16a   :  { %v105_v30 = vmul.f32 %v2313_v28, %v94_v29 }
 0x16c   :  { %v107_v31 = vsub.f32 %v2285_v12, %v105_v30 }
 0x16e   :  { %v109_v32 = vmul.f32 %v107_v31, %v107_v31 }
 0x170   :  { %v111_v33 = vsel %vm91_vm3, %v109_v32, 0.0  ;;  %v2223_v32 = vmov -1e+30  }
 0x171   :  { %112 = vadd.xlane.f32.xlu2 %v111_v33  ;;  %v220_v33 = vsel %vm219_vm12, 0.0, %v2223_v32 }
 0x177   :  { %v97_v34 = vpop.xlane.xlu1 %96 }
 0x178   :  { %v106_v35 = vmul.f32 %v2313_v28, %v97_v34 }
 0x17a   :  { %v108_v36 = vsub.f32 %v2289_v14, %v106_v35 }
 0x17c   :  { %v110_v37 = vmul.f32 %v108_v36, %v108_v36 }
 0x17e   :  { %v114_v38 = vsel %vm91_vm3, %v110_v37, 0.0 }
 0x17f   :  { %115 = vadd.xlane.f32.xlu2 %v114_v38 }
 0x18f   :  { %v2060_v42 = vpop.permute.xlu1 %2059 }
 0x190   :  { %v2061_v43 = vunpack.i.l.bf16 %v2060_v42  ;;  %v2062_v44 = vunpack.i.h.bf16 %v2060_v42 }
 0x192   :  { %208 = vmatpush.msra.mxu2 %v2061_v43 }
 0x194   :  { %209 = vmatpush.msra.mxu2 %v2062_v44 }
 0x1e4   :  { %v113_v45 = vpop.xlane.xlu2 %112 }
 0x1e5   :  { %v117_v46 = vmul.f32 %v113_v45, %v2313_v28 }
 0x1e7   :  { %v119_v47 = vadd.f32 1e-05, %v117_v46 }
 0x1e9   :  { %2135 = vrsqrt.f32 %v119_v47  ;;  %vm127_vm6 = vweird.f32 %v119_v47 }
 0x1ef   :  { %v2136_v48 = vpop.eup %2135 }
 0x1f0   :  { %v122_v49 = vmul.f32 %v2136_v48, %v119_v47  ;;  %vm128_vm5 = vweird.f32 %v2136_v48 }
 0x1f1   :  { %vm129_vm7 = vmor %vm127_vm6, %vm128_vm5 }
 0x1f2   :  { %v123_v50 = vmul.f32 %v2136_v48, %v122_v49  ;;  %v116_v51 = vpop.xlane.xlu2 %115 }
 0x1f3   :  { %v118_v52 = vmul.f32 %v116_v51, %v2313_v28 }
 0x1f4   :  { %v124_v53 = vmul.f32 0.5, %v123_v50 }
 0x1f5   :  { %v120_v54 = vadd.f32 1e-05, %v118_v52 }
 0x1f6   :  { %v125_v55 = vsub.f32 1.5, %v124_v53 }
 0x1f7   :  { %2137 = vrsqrt.f32 %v120_v54  ;;  %vm137_vm9 = vweird.f32 %v120_v54 }
 0x1f8   :  { %v126_v57 = vmul.f32 %v2136_v48, %v125_v55 }
 0x1fa   :  { %v130_v59 = vsel %vm129_vm7, %v2136_v48, %v126_v57 }
 0x1fb   :  { %v141_v60 = vmul.f32 %v130_v59, %v107_v31 }
 0x1fd   :  { %v2138_v62 = vpop.eup %2137  ;;  %v144_v63 = vmul.f32 %v2329_v58, %v141_v60 }
 0x1fe   :  { %v132_v0 = vmul.f32 %v2138_v62, %v120_v54  ;;  %vm138_vm8 = vweird.f32 %v2138_v62 }
 0x1ff   :  { %v147_v1 = vadd.f32 %v2332_v61, %v144_v63  ;;  %vm139_vm10 = vmor %vm137_vm9, %vm138_vm8 }
 0x200   :  { %v133_v2 = vmul.f32 %v2138_v62, %v132_v0 }
 0x201   :  { %1971 = vmatmul.msk.f32.vlgmr.msrb.gmra.mxu0 %vm91_vm3, %v147_v1  ;;  %1973 = vmatmul.msk.f32.vlgmr.msra.gmra.mxu2 %vm91_vm3, %v147_v1 }
 0x202   :  { %v134_v3 = vmul.f32 0.5, %v133_v2 }
 0x204   :  { %v135_v4 = vsub.f32 1.5, %v134_v3 }
 0x206   :  { %v136_v7 = vmul.f32 %v2138_v62, %v135_v4 }
 0x208   :  { %v140_v8 = vsel %vm139_vm10, %v2138_v62, %v136_v7 }
 0x209   :  { %v142_v9 = vmul.f32 %v140_v8, %v108_v36 }
 0x20b   :  { %v145_v10 = vmul.f32 %v2329_v58, %v142_v9 }
 0x20d   :  { %v148_v11 = vadd.f32 %v2332_v61, %v145_v10 }
 0x20f   :  { %1972 = vmatmul.msk.f32.gmra.mxu0 %vm91_vm3, %v148_v11  ;;  %1974 = vmatmul.msk.f32.gmra.mxu2 %vm91_vm3, %v148_v11 }
 0x27e   :  { %v172_v13 = vpop.f32.mrf.mxu0 }
 0x27f   :  { %378 = vrot.lane.b32.xlu0 %v172_v13, %s2220_s14 }
 0x284   :  { %v2343_v15 = vpop.f32.mrf.mxu2 }
 0x285   :  { %1975 = vmatpush.xpose.msk.msrb.mxu3 %vm221_vm11, %v2343_v15 }
 0x287   :  { %380 = vrot.lane.b32.xlu0 %v2343_v15, %s2220_s14 }
 0x288   :  { %1976 = vmatmul.msk.f32.vlgmr.msrb.gmra.mxu3 %vm221_vm11, %v172_v13 }
 0x28c   :  { %v175_v16 = vpop.f32.mrf.mxu0 }
 0x28d   :  { %566 = vrot.lane.b32.xlu1 %v175_v16, %s2221_s15 }
 0x28f   :  { %406 = vrot.lane.b32.xlu0 %v175_v16, %s2220_s14 }
 0x292   :  { %v2352_v17 = vpop.f32.mrf.mxu2 }
 0x293   :  { %408 = vrot.lane.b32.xlu2 %v2352_v17, %s2220_s14  ;;  %1977 = vmatpush.xpose.msk.msra.mxu3 %vm221_vm11, %v2352_v17 }
 0x295   :  { %728 = vrot.lane.b32.xlu1 %v2352_v17, %s2222_s16 }
 0x296   :  { %1978 = vmatmul.msk.f32.vlgmr.msra.gmra.mxu3 %vm221_vm11, %v175_v16 }
 0x297   :  { %540 = vrot.lane.b32.xlu0 %v2343_v15, %s2221_s15 }
 0x29b   :  { %568 = vrot.lane.b32.xlu2 %v2352_v17, %s2221_s15 }
 0x29d   :  { %698 = vrot.lane.b32.xlu1 %v172_v13, %s2222_s16 }
 0x29f   :  { %726 = vrot.lane.b32.xlu0 %v175_v16, %s2222_s16 }
 0x2a3   :  { %538 = vrot.lane.b32.xlu2 %v172_v13, %s2221_s15 }
 0x2ab   :  { %700 = vrot.lane.b32.xlu2 %v2343_v15, %s2222_s16 }
 0x2ed   :  { %v409_v18 = vpop.permute.xlu2 %408 }
 0x2ee   :  { %1983 = vmatpush.xpose.msk.msrb.mxu2 %vm221_vm11, %v409_v18 }
 0x2f1   :  { %v379_v19 = vpop.permute.xlu0 %378 }
 0x2f5   :  { %v569_v20 = vpop.permute.xlu2 %568 }
 0x2f6   :  { %1989 = vmatpush.xpose.msk.msra.mxu2 %vm221_vm11, %v569_v20 }
 0x2f9   :  { %v381_v21 = vpop.permute.xlu0 %380 }
 0x2fa   :  { %1981 = vmatpush.xpose.msk.msra.mxu1 %vm221_vm11, %v381_v21  ;;  %v2402_v21 = vpack.i.bf16 %v2352_v17, %v2343_v15 }
 0x2fd   :  { %1982 = vmatmul.msk.f32.vlgmr.msra.gmra.mxu1 %vm221_vm11, %v379_v19  ;;  %v539_v23 = vpop.permute.xlu2 %538 }
 0x2ff   :  { %v567_v22 = vpop.permute.xlu1 %566 }
 0x301   :  { %v407_v25 = vpop.permute.xlu0 %406 }
 0x302   :  { %1984 = vmatmul.msk.f32.vlgmr.msrb.gmra.mxu2 %vm221_vm11, %v407_v25 }
 0x305   :  { %v701_v31 = vpop.permute.xlu2 %700 }
 0x307   :  { %v729_v29 = vpop.permute.xlu1 %728 }
 0x308   :  { %1995 = vmatpush.xpose.msk.msrb.mxu2 %vm221_vm11, %v729_v29 }
 0x309   :  { %v541_v30 = vpop.permute.xlu0 %540 }
 0x30a   :  { %1987 = vmatpush.xpose.msk.msrb.mxu1 %vm221_vm11, %v541_v30  ;;  %1990 = vmatmul.msk.f32.vlgmr.msra.gmra.mxu2 %vm221_vm11, %v567_v22 }
 0x30b   :  { %v245_v34 = vpop.f32.mrf.mxu3 }
 0x30c   :  { %v274_v35 = vmul.f32 0.35355338, %v245_v34 }
 0x30d   :  { %1988 = vmatmul.msk.f32.vlgmr.msrb.gmra.mxu1 %vm221_vm11, %v539_v23 }
 0x30e   :  { %1993 = vmatpush.xpose.msk.msra.mxu1 %vm221_vm11, %v701_v31  ;;  %v276_v5 = vadd.f32 %v274_v35, %v220_v33 }
 0x30f   :  { %v699_v37 = vpop.permute.xlu1 %698 }
 0x310   :  { %v278_v36 = vsel %vm221_vm11, %v276_v5, -inf }
 0x311   :  { %v727_v6 = vpop.permute.xlu0 %726  ;;  %279 = vmax.xlane.f32.xlu0 %v278_v36 }
 0x312   :  { %1996 = vmatmul.msk.f32.vlgmr.msrb.gmra.mxu2 %vm221_vm11, %v727_v6 }
 0x315   :  { %1994 = vmatmul.msk.f32.vlgmr.msra.gmra.mxu1 %vm221_vm11, %v699_v37 }
 0x319   :  { %v271_v38 = vpop.f32.mrf.mxu3 }
 0x31a   :  { %v275_v39 = vmul.f32 0.35355338, %v271_v38 }
 0x31c   :  { %v277_v40 = vadd.f32 %v275_v39, %v220_v33 }
 0x31e   :  { %v281_v41 = vsel %vm221_vm11, %v277_v40, -inf }
 0x31f   :  { %282 = vmax.xlane.f32.xlu2 %v281_v41 }
 0x37a   :  { %v403_v42 = vpop.f32.mrf.mxu1 }
 0x37b   :  { %v434_v43 = vmul.f32 0.35355338, %v403_v42 }
 0x37d   :  { %v436_v44 = vadd.f32 %v434_v43, %v220_v33 }
 0x37f   :  { %v438_v45 = vsel %vm221_vm11, %v436_v44, -inf }
 0x380   :  { %439 = vmax.xlane.f32.xlu1 %v438_v45 }
 0x384   :  { %v280_v46 = vpop.xlane.xlu0 %279 }
 0x385   :  { %v284_v47 = vsub.f32 %v276_v5, %v280_v46  ;;  %v431_v48 = vpop.f32.mrf.mxu2 }
 0x386   :  { %v435_v49 = vmul.f32 0.35355338, %v431_v48 }
 0x387   :  { %v286_v50 = vmul.f32 1.442695, %v284_v47 }
 0x388   :  { %v437_v51 = vadd.f32 %v435_v49, %v220_v33 }
 0x389   :  { %2139 = vpow2.f32 %v286_v50 }
 0x38a   :  { %v563_v52 = vpop.f32.mrf.mxu1  ;;  %v441_v53 = vsel %vm221_vm11, %v437_v51, -inf }
 0x38b   :  { %v594_v54 = vmul.f32 0.35355338, %v563_v52  ;;  %442 = vmax.xlane.f32.xlu2 %v441_v53 }
 0x38d   :  { %v591_v55 = vpop.f32.mrf.mxu2  ;;  %v596_v57 = vadd.f32 %v594_v54, %v220_v33 }
 0x38e   :  { %v595_v62 = vmul.f32 0.35355338, %v591_v55 }
 0x38f   :  { %v2388_v59 = vpop.eup %2139  ;;  %v598_v60 = vsel %vm221_vm11, %v596_v57, -inf }
 0x390   :  { %599 = vmax.xlane.f32.xlu0 %v598_v60  ;;  %v290_v63 = vsel %vm221_vm11, %v2388_v59, 0.0  ;;  %v597_v4 = vadd.f32 %v595_v62, %v220_v33 }
 0x391   :  { %291 = vadd.xlane.f32.xlu1 %v290_v63 }
 0x392   :  { %v723_v0 = vpop.f32.mrf.mxu1  ;;  %v283_v1 = vpop.xlane.xlu2 %282  ;;  %v601_v13 = vsel %vm221_vm11, %v597_v4, -inf }
 0x393   :  { %v754_v2 = vmul.f32 0.35355338, %v723_v0  ;;  %v285_v3 = vsub.f32 %v277_v40, %v283_v1 }
 0x395   :  { %v288_v7 = vmul.f32 1.442695, %v285_v3  ;;  %v751_v8 = vpop.f32.mrf.mxu2  ;;  %v756_v9 = vadd.f32 %v754_v2, %v220_v33 }
 0x396   :  { %v755_v10 = vmul.f32 0.35355338, %v751_v8 }
 0x397   :  { %2141 = vpow2.f32 %v288_v7  ;;  %v758_v11 = vsel %vm221_vm11, %v756_v9, -inf }
 0x398   :  { %759 = vmax.xlane.f32.xlu2 %v758_v11  ;;  %v757_v16 = vadd.f32 %v755_v10, %v220_v33 }
 0x399   :  { %602 = vmax.xlane.f32.xlu1 %v601_v13 }
 0x39a   :  { %v761_v18 = vsel %vm221_vm11, %v757_v16, -inf }
 0x39b   :  { %762 = vmax.xlane.f32.xlu0 %v761_v18 }
 0x39d   :  { %v2396_v19 = vpop.eup %2141 }
 0x39e   :  { %v293_v20 = vsel %vm221_vm11, %v2396_v19, 0.0 }
 0x3a0   :  { %294 = vadd.xlane.f32.xlu2 %v293_v20 }
 0x3b2   :  { %2064 = vrot.lane.b32.xlu1 %v2402_v21, %s2219_s11 }
 0x3f3   :  { %v440_v22 = vpop.xlane.xlu1 %439 }
 0x3f4   :  { %v444_v23 = vsub.f32 %v436_v44, %v440_v22 }
 0x3f6   :  { %v446_v25 = vmul.f32 1.442695, %v444_v23 }
 0x3f8   :  { %2143 = vpow2.f32 %v446_v25 }
 0x3fe   :  { %v2406_v27 = vpop.eup %2143  ;;  %v443_v29 = vpop.xlane.xlu2 %442 }
 0x3ff   :  { %v445_v30 = vsub.f32 %v437_v51, %v443_v29  ;;  %v450_v31 = vsel %vm221_vm11, %v2406_v27, 0.0 }
 0x400   :  { %451 = vadd.xlane.f32.xlu0 %v450_v31 }
 0x401   :  { %v448_v32 = vmul.f32 1.442695, %v445_v30 }
 0x403   :  { %2145 = vpow2.f32 %v448_v32  ;;  %v600_v33 = vpop.xlane.xlu0 %599 }
 0x404   :  { %v604_v15 = vsub.f32 %v596_v57, %v600_v33  ;;  %v292_v17 = vpop.xlane.xlu1 %291 }
 0x405   :  { %2147 = vrcp.f32 %v292_v17  ;;  %v307_v63 = vand.u32 2147483648, %v292_v17  ;;  %vm301_vm14 = vweird.f32 %v292_v17  ;;  %v305_v1 = vand.u32 2147483647, %v292_v17 }
 0x406   :  { %v606_v34 = vmul.f32 1.442695, %v604_v15 }
 0x407   :  { %vm306_vm4 = vcmp.eq.f32.partialorder %v305_v1, 8.507059e+37 }
 0x408   :  { %2149 = vpow2.f32 %v606_v34 }
 0x409   :  { %v2410_v35 = vpop.eup %2145 }
 0x40a   :  { %v453_v5 = vsel %vm221_vm11, %v2410_v35, 0.0 }
 0x40b   :  { %454 = vadd.xlane.f32.xlu1 %v453_v5  ;;  %v760_v36 = vpop.xlane.xlu2 %759  ;;  %v2148_v38 = vpop.eup %2147 }
 0x40c   :  { %v764_v6 = vsub.f32 %v756_v9, %v760_v36  ;;  %v603_v37 = vpop.xlane.xlu1 %602  ;;  %v297_v46 = vmul.f32 %v2148_v38, %v292_v17  ;;  %vm302_vm13 = vweird.f32 %v2148_v38  ;;  %v308_v9 = vor.u32 1.1754944e-38, %v307_v63 }
 0x40d   :  { %v605_v39 = vsub.f32 %v597_v4, %v603_v37  ;;  %vm303_vm15 = vmor %vm301_vm14, %vm302_vm13 }
 0x40e   :  { %v2414_v40 = vpop.eup %2149  ;;  %v766_v41 = vmul.f32 1.442695, %v764_v6  ;;  %v763_v42 = vpop.xlane.xlu0 %762  ;;  %v298_v49 = vsub.f32 1.0, %v297_v46 }
 0x40f   :  { %v608_v43 = vmul.f32 1.442695, %v605_v39  ;;  %v765_v44 = vsub.f32 %v757_v16, %v763_v42  ;;  %v610_v45 = vsel %vm221_vm11, %v2414_v40, 0.0 }
 0x410   :  { %2151 = vpow2.f32 %v766_v41  ;;  %611 = vadd.xlane.f32.xlu2 %v610_v45  ;;  %v299_v53 = vmul.f32 %v2148_v38, %v298_v49 }
 0x411   :  { %2153 = vpow2.f32 %v608_v43  ;;  %v768_v47 = vmul.f32 1.442695, %v765_v44 }
 0x412   :  { %v300_v60 = vadd.f32 %v2148_v38, %v299_v53 }
 0x413   :  { %v295_v48 = vpop.xlane.xlu2 %294 }
 0x414   :  { %2155 = vrcp.f32 %v295_v48  ;;  %v322_v2 = vand.u32 2147483648, %v295_v48  ;;  %v320_v4 = vand.u32 2147483647, %v295_v48  ;;  %v304_v7 = vsel %vm303_vm15, %v2148_v38, %v300_v60 }
 0x415   :  { %2157 = vpow2.f32 %v768_v47  ;;  %vm316_vm2 = vweird.f32 %v295_v48  ;;  %v309_v13 = vsel %vm306_vm4, %v308_v9, %v304_v7 }
 0x416   :  { %v2418_v50 = vpop.eup %2151  ;;  %v323_v11 = vor.u32 1.1754944e-38, %v322_v2  ;;  %vm321_vm6 = vcmp.eq.f32.partialorder %v320_v4, 8.507059e+37  ;;  %v310_v29 = vmul.f32 %v2388_v59, %v309_v13 }
 0x417   :  { %v2420_v51 = vpop.eup %2153  ;;  %v770_v52 = vsel %vm221_vm11, %v2418_v50, 0.0 }
 0x418   :  { %771 = vadd.xlane.f32.xlu2 %v770_v52  ;;  %v613_v54 = vsel %vm221_vm11, %v2420_v51, 0.0 }
 0x419   :  { %614 = vadd.xlane.f32.xlu0 %v613_v54 }
 0x41a   :  { %v2156_v55 = vpop.eup %2155 }
 0x41b   :  { %v312_v57 = vmul.f32 %v2156_v55, %v295_v48  ;;  %v2426_v62 = vpop.eup %2157  ;;  %vm317_vm1 = vweird.f32 %v2156_v55 }
 0x41c   :  { %v773_v8 = vsel %vm221_vm11, %v2426_v62, 0.0  ;;  %vm318_vm5 = vmor %vm316_vm2, %vm317_vm1 }
 0x41d   :  { %v313_v0 = vsub.f32 1.0, %v312_v57 }
 0x41f   :  { %v314_v3 = vmul.f32 %v2156_v55, %v313_v0 }
 0x421   :  { %v315_v10 = vadd.f32 %v2156_v55, %v314_v3  ;;  %774 = vadd.xlane.f32.xlu0 %v773_v8 }
 0x423   :  { %v319_v16 = vsel %vm318_vm5, %v2156_v55, %v315_v10 }
 0x424   :  { %v324_v18 = vsel %vm321_vm6, %v323_v11, %v319_v16  ;;  %v2065_v20 = vpop.permute.xlu1 %2064  ;;  %2079 = vrot.lane.b32.xlu1 %v2402_v21, %s2224_s17 }
 0x425   :  { %v2067_v22 = vunpack.i.h.bf16 %v2065_v20  ;;  %v2066_v23 = vunpack.i.l.bf16 %v2065_v20  ;;  %v325_v25 = vmul.f32 %v2396_v19, %v324_v18 }
 0x427   :  { %347 = vmatpush.msra.mxu0 %v2066_v23  ;;  %373 = vmatpush.msrb.mxu3 %v2067_v22 }
 0x428   :  { %1979 = vmatmul.msk.f32.vlgmr.msra.gmra.mxu0 %vm221_vm11, %v310_v29  ;;  %1980 = vmatmul.msk.f32.vlgmr.msrb.gmra.mxu3 %vm221_vm11, %v325_v25 }
 0x42c   :  { %2084 = vrot.lane.b32.xlu1 %v2302_v24, %s2227_s20 }
 0x430   :  { %2069 = vrot.lane.b32.xlu2 %v2402_v21, %s2225_s18 }
 0x435   :  { %2074 = vrot.lane.b32.xlu0 %v2402_v21, %s2226_s19 }
 0x438   :  { %2089 = vrot.lane.b32.xlu2 %v2307_v26, %s2227_s20 }
 0x473   :  { %v452_v30 = vpop.xlane.xlu0 %451 }
 0x474   :  { %2159 = vrcp.f32 %v452_v30  ;;  %v467_v41 = vand.u32 2147483648, %v452_v30  ;;  %vm461_vm10 = vweird.f32 %v452_v30  ;;  %v465_v43 = vand.u32 2147483647, %v452_v30 }
 0x476   :  { %v468_v48 = vor.u32 1.1754944e-38, %v467_v41  ;;  %vm466_vm15 = vcmp.eq.f32.partialorder %v465_v43, 8.507059e+37  ;;  %v36_v41 = vld [vmem:[%s2915_s3 + $0x68] sm:$0xff] }
 0x477   :  { %1049 = vmatpush.msra.mxu2 %v36_v41 }
 0x47a   :  { %v2160_v31 = vpop.eup %2159 }
 0x47b   :  { %v457_v59 = vmul.f32 %v2160_v31, %v452_v30  ;;  %vm462_vm8 = vweird.f32 %v2160_v31 }
 0x47c   :  { %vm463_vm13 = vmor %vm461_vm10, %vm462_vm8 }
 0x47d   :  { %v458_v33 = vsub.f32 1.0, %v457_v59 }
 0x47e   :  { %v455_v19 = vpop.xlane.xlu1 %454 }
 0x47f   :  { %2161 = vrcp.f32 %v455_v19  ;;  %v459_v34 = vmul.f32 %v2160_v31, %v458_v33  ;;  %v482_v38 = vand.u32 2147483648, %v455_v19  ;;  %vm476_vm9 = vweird.f32 %v455_v19 }
 0x480   :  { %v480_v42 = vand.u32 2147483647, %v455_v19 }
 0x481   :  { %v460_v21 = vadd.f32 %v2160_v31, %v459_v34  ;;  %v483_v47 = vor.u32 1.1754944e-38, %v482_v38 }
 0x482   :  { %vm481_vm14 = vcmp.eq.f32.partialorder %v480_v42, 8.507059e+37 }
 0x483   :  { %v2440_v32 = vpop.xlane.xlu2 %611  ;;  %v464_v46 = vsel %vm463_vm13, %v2160_v31, %v460_v21 }
 0x484   :  { %2163 = vrcp.f32 %v2440_v32  ;;  %v469_v54 = vsel %vm466_vm15, %v468_v48, %v464_v46  ;;  %vm621_vm4 = vweird.f32 %v2440_v32  ;;  %v627_v18 = vand.u32 2147483648, %v2440_v32 }
 0x485   :  { %v2162_v15 = vpop.eup %2161  ;;  %v470_v3 = vmul.f32 %v2406_v27, %v469_v54  ;;  %v625_v22 = vand.u32 2147483647, %v2440_v32 }
 0x486   :  { %v472_v17 = vmul.f32 %v2162_v15, %v455_v19  ;;  %vm477_vm7 = vweird.f32 %v2162_v15  ;;  %v628_v19 = vor.u32 1.1754944e-38, %v627_v18 }
 0x487   :  { %vm478_vm12 = vmor %vm476_vm9, %vm477_vm7  ;;  %vm626_vm8 = vcmp.eq.f32.partialorder %v625_v22, 8.507059e+37 }
 0x488   :  { %v473_v5 = vsub.f32 1.0, %v472_v17 }
 0x48a   :  { %v474_v36 = vmul.f32 %v2162_v15, %v473_v5  ;;  %v2164_v44 = vpop.eup %2163 }
 0x48b   :  { %v2443_v6 = vpop.xlane.xlu2 %771  ;;  %v617_v52 = vmul.f32 %v2164_v44, %v2440_v32  ;;  %vm622_vm1 = vweird.f32 %v2164_v44 }
 0x48c   :  { %v475_v37 = vadd.f32 %v2162_v15, %v474_v36  ;;  %v2445_v39 = vpop.xlane.xlu0 %614  ;;  %vm623_vm5 = vmor %vm621_vm4, %vm622_vm1  ;;  %vm781_vm10 = vweird.f32 %v2443_v6  ;;  %v785_v17 = vand.u32 2147483647, %v2443_v6  ;;  %v787_v21 = vand.u32 2147483648, %v2443_v6 }
 0x48d   :  { %2165 = vrcp.f32 %v2445_v39  ;;  %v618_v2 = vsub.f32 1.0, %v617_v52  ;;  %v642_v20 = vand.u32 2147483648, %v2445_v39  ;;  %vm636_vm6 = vweird.f32 %v2445_v39 }
 0x48e   :  { %v479_v45 = vsel %vm478_vm12, %v2162_v15, %v475_v37  ;;  %2167 = vrcp.f32 %v2443_v6  ;;  %v640_v23 = vand.u32 2147483647, %v2445_v39 }
 0x48f   :  { %v484_v49 = vsel %vm481_vm14, %v483_v47, %v479_v45  ;;  %v619_v8 = vmul.f32 %v2164_v44, %v618_v2  ;;  %v643_v59 = vor.u32 1.1754944e-38, %v642_v20 }
 0x490   :  { %v485_v1 = vmul.f32 %v2410_v35, %v484_v49  ;;  %vm641_vm9 = vcmp.eq.f32.partialorder %v640_v23, 8.507059e+37 }
 0x491   :  { %v620_v11 = vadd.f32 %v2164_v44, %v619_v8 }
 0x493   :  { %v2166_v53 = vpop.eup %2165  ;;  %v2070_v55 = vpop.permute.xlu2 %2069  ;;  %v624_v25 = vsel %vm623_vm5, %v2164_v44, %v620_v11  ;;  %vm886_vm5 = vcmask 195584  }
 0x494   :  { %v632_v57 = vmul.f32 %v2166_v53, %v2445_v39  ;;  %v2072_v60 = vunpack.i.h.bf16 %v2070_v55  ;;  %v2451_v63 = vpop.xlane.xlu0 %774  ;;  %v2071_v0 = vunpack.i.l.bf16 %v2070_v55  ;;  %v2459_v7 = vpop.eup %2167  ;;  %vm637_vm2 = vweird.f32 %v2166_v53 }
 0x495   :  { %2169 = vrcp.f32 %v2451_v63  ;;  %v777_v35 = vmul.f32 %v2459_v7, %v2443_v6  ;;  %vm638_vm7 = vmor %vm636_vm6, %vm637_vm2  ;;  %v629_v33 = vsel %vm626_vm8, %v628_v19, %v624_v25  ;;  %vm782_vm12 = vweird.f32 %v2459_v7 }
 0x496   :  { %533 = vmatpush.msra.mxu3 %v2072_v60  ;;  %v633_v4 = vsub.f32 1.0, %v632_v57  ;;  %507 = vmatpush.msrb.mxu0 %v2071_v0  ;;  %v2080_v5 = vpop.permute.xlu1 %2079  ;;  %v802_v37 = vand.u32 2147483648, %v2451_v63  ;;  %vm2484_vm14 = vmor %vm781_vm10, %vm782_vm12  ;;  %vm796_vm15 = vweird.f32 %v2451_v63  ;;  %v800_v42 = vand.u32 2147483647, %v2451_v63 }
 0x497   :  { %1986 = vmatmul.msk.f32.vlgmr.msra.gmra.mxu3 %vm221_vm11, %v485_v1  ;;  %1985 = vmatmul.msk.f32.vlgmr.msrb.gmra.mxu0 %vm221_vm11, %v470_v3  ;;  %v778_v27 = vsub.f32 1.0, %v777_v35  ;;  %v630_v43 = vmul.f32 %v2414_v40, %v629_v33  ;;  %v2082_v6 = vunpack.i.h.bf16 %v2080_v5  ;;  %v2081_v46 = vunpack.i.l.bf16 %v2080_v5 }
 0x498   :  { %v634_v10 = vmul.f32 %v2166_v53, %v633_v4  ;;  %v788_v40 = vor.u32 1.1754944e-38, %v787_v21  ;;  %vm786_vm2 = vcmp.eq.f32.partialorder %v785_v17, 8.507059e+37  ;;  %vm801_vm4 = vcmp.eq.f32.partialorder %v800_v42, 8.507059e+37 }
 0x499   :  { %v779_v29 = vmul.f32 %v2459_v7, %v778_v27 }
 0x49a   :  { %v635_v13 = vadd.f32 %v2166_v53, %v634_v10 }
 0x49b   :  { %v2462_v9 = vpop.eup %2169  ;;  %v780_v15 = vadd.f32 %v2459_v7, %v779_v29  ;;  %v2090_v4 = vpop.permute.xlu2 %2089 }
 0x49c   :  { %v792_v26 = vmul.f32 %v2462_v9, %v2451_v63  ;;  %v639_v30 = vsel %vm638_vm7, %v2166_v53, %v635_v13  ;;  %vm797_vm13 = vweird.f32 %v2462_v9  ;;  %v2092_v8 = vunpack.i.h.bf16 %v2090_v4 }
 0x49d   :  { %v644_v32 = vsel %vm641_vm9, %v643_v59, %v639_v30  ;;  %vm2492_vm1 = vmor %vm796_vm15, %vm797_vm13  ;;  %v784_v47 = vsel %vm2484_vm14, %v2459_v7, %v780_v15  ;;  %v2091_v7 = vunpack.i.l.bf16 %v2090_v4  ;;  %v889_v30 = vperm.slane %v2326_v56, 6 }
 0x49e   :  { %v793_v16 = vsub.f32 1.0, %v792_v26  ;;  %v645_v44 = vmul.f32 %v2420_v51, %v644_v32  ;;  %v803_v51 = vor.u32 1.1754944e-38, %v802_v37  ;;  %v789_v49 = vsel %vm786_vm2, %v788_v40, %v784_v47  ;;  %v2085_v1 = vpop.permute.xlu1 %2084 }
 0x49f   :  { %v790_v53 = vmul.f32 %v2418_v50, %v789_v49  ;;  %v2087_v2 = vunpack.i.h.bf16 %v2085_v1  ;;  %v2086_v3 = vunpack.i.l.bf16 %v2085_v1  ;;  %v28_v49 = vld [vmem:[%s2915_s3 + $0x28] sm:$0xff] }
 0x4a0   :  { %v794_v31 = vmul.f32 %v2462_v9, %v793_v16 }
 0x4a1   :  { %920 = vmatpush.msrb.mxu1 %v2086_v3 }
 0x4a2   :  { %v795_v34 = vadd.f32 %v2462_v9, %v794_v31 }
 0x4a3   :  { %921 = vmatpush.msrb.mxu1 %v2087_v2 }
 0x4a4   :  { %v799_v48 = vsel %vm2492_vm1, %v2462_v9, %v795_v34  ;;  %v89_v9 = vld [vmem:[%s2917_s1] sm:$0xff]  ;;  %v90_v34 = vld [vmem:[%s2917_s1 + $0x8] sm:$0xff] }
 0x4a5   :  { %v804_v52 = vsel %vm801_vm4, %v803_v51, %v799_v48  ;;  %v349_v55 = vpop.f32.mrf.mxu0  ;;  %922 = vmatpush.msrb.mxu1 %v2091_v7  ;;  %v981_v35 = vsel %vm91_vm3, %v89_v9, 0.0 }
 0x4a6   :  { %v805_v54 = vmul.f32 %v2426_v62, %v804_v52 }
 0x4a7   :  { %v2075_v36 = vpop.permute.xlu0 %2074  ;;  %923 = vmatpush.msrb.mxu1 %v2092_v8 }
 0x4a8   :  { %v2077_v38 = vunpack.i.h.bf16 %v2075_v36  ;;  %v2076_v39 = vunpack.i.l.bf16 %v2075_v36 }
 0x4aa   :  { %667 = vmatpush.msra.mxu0 %v2076_v39  ;;  %693 = vmatpush.msrb.mxu3 %v2077_v38 }
 0x4ab   :  { %1991 = vmatmul.msk.f32.vlgmr.msra.gmra.mxu0 %vm221_vm11, %v630_v43  ;;  %1992 = vmatmul.msk.f32.vlgmr.msrb.gmra.mxu3 %vm221_vm11, %v645_v44  ;;  %v375_v57 = vpop.f32.mrf.mxu3 }
 0x4ac   :  { %827 = vmatpush.msrb.mxu0 %v2081_v46  ;;  %853 = vmatpush.msra.mxu3 %v2082_v6 }
 0x4b3   :  { %1997 = vmatmul.msk.f32.vlgmr.msrb.gmra.mxu0 %vm221_vm11, %v790_v53  ;;  %1998 = vmatmul.msk.f32.vlgmr.msra.gmra.mxu3 %vm221_vm11, %v805_v54  ;;  %v24_v54 = vld [vmem:[%s2915_s3 + $0x8] sm:$0xff] }
 0x514   :  { %v509_v60 = vpop.f32.mrf.mxu0 }
 0x515   :  { %860 = vrot.lane.b32.xlu0 %v509_v60, %s2228_s21 }
 0x51a   :  { %v535_v63 = vpop.f32.mrf.mxu3 }
 0x51b   :  { %862 = vrot.lane.b32.xlu2 %v535_v63, %s2228_s21 }
 0x528   :  { %v669_v0 = vpop.f32.mrf.mxu0 }
 0x529   :  { %868 = vrot.lane.b32.xlu1 %v669_v0, %s2229_s22  ;;  %v2585_v0 = vpack.i.bf16 %v24_v54, %v28_v49 }
 0x52e   :  { %v695_v50 = vpop.f32.mrf.mxu3 }
 0x530   :  { %v829_v62 = vpop.f32.mrf.mxu0 }
 0x531   :  { %870 = vrot.lane.b32.xlu1 %v695_v50, %s2229_s22  ;;  %876 = vrot.lane.b32.xlu0 %v829_v62, %s2230_s23 }
 0x536   :  { %v855_v24 = vpop.f32.mrf.mxu3 }
 0x539   :  { %878 = vrot.lane.b32.xlu0 %v855_v24, %s2230_s23 }
 0x55b   :  { %982 = vadd.xlane.f32.xlu1 %v981_v35 }
 0x575   :  { %v863_v18 = vpop.permute.xlu2 %862 }
 0x576   :  { %v883_v22 = vsel %vm221_vm11, %v375_v57, %v863_v18 }
 0x587   :  { %v861_v10 = vpop.permute.xlu0 %860 }
 0x588   :  { %v882_v11 = vsel %vm221_vm11, %v349_v55, %v861_v10 }
 0x59b   :  { %v869_v26 = vpop.permute.xlu1 %868 }
 0x59c   :  { %v884_v27 = vsel %vm59_vm0, %v882_v11, %v869_v26 }
 0x5a3   :  { %v877_v13 = vpop.permute.xlu0 %876  ;;  %v871_v20 = vpop.permute.xlu1 %870 }
 0x5a4   :  { %v887_v16 = vsel %vm886_vm5, %v884_v27, %v877_v13  ;;  %v885_v23 = vsel %vm59_vm0, %v883_v22, %v871_v20 }
 0x5a5   :  { %1999 = vmatmul.msk.f32.vlgmr.msrb.gmra.mxu1 %vm91_vm3, %v887_v16 }
 0x5ab   :  { %v879_v25 = vpop.permute.xlu0 %878 }
 0x5ac   :  { %v888_v29 = vsel %vm886_vm5, %v885_v23, %v879_v25 }
 0x5ad   :  { %2000 = vmatmul.msk.f32.gmra.mxu1 %vm91_vm3, %v888_v29 }
 0x5ce   :  { %v983_v33 = vpop.xlane.xlu1 %982 }
 0x5cf   :  { %v987_v15 = vmul.f32 %v983_v33, %v2313_v28 }
 0x5d1   :  { %v2541_v21 = vsub.f32 %v89_v9, %v987_v15 }
 0x5d3   :  { %v991_v38 = vmul.f32 %v2541_v21, %v2541_v21 }
 0x5d5   :  { %v993_v39 = vsel %vm91_vm3, %v991_v38, 0.0 }
 0x622   :  { %v925_v31 = vpop.f32.mrf.mxu1 }
 0x623   :  { %v926_v19 = vadd.f32 %v925_v31, %v889_v30 }
 0x625   :  { %v2530_v59 = vadd.f32 %v926_v19, %v2285_v12  ;;  %v984_v12 = vsel %vm91_vm3, %v90_v34, 0.0 }
 0x627   :  { %v933_v32 = vsel %vm91_vm3, %v2530_v59, 0.0 }
 0x628   :  { %934 = vadd.xlane.f32.xlu2 %v933_v32 }
 0x62a   :  { %v928_v17 = vpop.f32.mrf.mxu1 }
 0x62b   :  { %v929_v5 = vadd.f32 %v928_v17, %v889_v30  ;;  %v1025_v30 = vperm.slane %v2326_v56, 2 }
 0x62d   :  { %v2539_v36 = vadd.f32 %v929_v5, %v2289_v14  ;;  %v32_v14 = vld [vmem:[%s2915_s3 + $0x48] sm:$0xff] }
 0x62e   :  { %v2555_v42 = vpack.i.bf16 %v32_v14, %v36_v41  ;;  %1050 = vmatpush.msra.mxu2 %v32_v14 }
 0x62f   :  { %v936_v37 = vsel %vm91_vm3, %v2539_v36, 0.0 }
 0x630   :  { %985 = vadd.xlane.f32.xlu2 %v984_v12  ;;  %937 = vadd.xlane.f32.xlu0 %v936_v37 }
 0x631   :  { %1051 = vmatpush.msra.mxu2 %v28_v49 }
 0x633   :  { %1052 = vmatpush.msra.mxu2 %v24_v54 }
 0x638   :  { %994 = vadd.xlane.f32.xlu0 %v993_v39 }
 0x64c   :  { %2094 = vrot.lane.b32.xlu0 %v2555_v42, %s2219_s11 }
 0x69b   :  { %v935_v43 = vpop.xlane.xlu2 %934 }
 0x69c   :  { %v939_v44 = vmul.f32 %v935_v43, %v2313_v28 }
 0x69e   :  { %v2561_v45 = vsub.f32 %v2530_v59, %v939_v44 }
 0x6a0   :  { %v943_v6 = vmul.f32 %v2561_v45, %v2561_v45 }
 0x6a2   :  { %v945_v46 = vsel %vm91_vm3, %v943_v6, 0.0 }
 0x6a3   :  { %946 = vadd.xlane.f32.xlu1 %v945_v46  ;;  %v986_v47 = vpop.xlane.xlu2 %985  ;;  %v938_v48 = vpop.xlane.xlu0 %937 }
 0x6a4   :  { %v988_v40 = vmul.f32 %v986_v47, %v2313_v28  ;;  %v940_v51 = vmul.f32 %v938_v48, %v2313_v28 }
 0x6a6   :  { %v2571_v52 = vsub.f32 %v90_v34, %v988_v40  ;;  %v2574_v53 = vsub.f32 %v2539_v36, %v940_v51  ;;  %v1028_v34 = vperm.slane %v2326_v56, 3 }
 0x6a8   :  { %v992_v55 = vmul.f32 %v2571_v52, %v2571_v52  ;;  %v944_v57 = vmul.f32 %v2574_v53, %v2574_v53 }
 0x6aa   :  { %v996_v60 = vsel %vm91_vm3, %v992_v55, 0.0  ;;  %v948_v63 = vsel %vm91_vm3, %v944_v57, 0.0 }
 0x6ab   :  { %997 = vadd.xlane.f32.xlu1 %v996_v60  ;;  %949 = vadd.xlane.f32.xlu2 %v948_v63  ;;  %v995_v50 = vpop.xlane.xlu0 %994 }
 0x6ac   :  { %v999_v62 = vmul.f32 %v995_v50, %v2313_v28 }
 0x6ae   :  { %v1001_v24 = vadd.f32 1e-05, %v999_v62 }
 0x6b0   :  { %2171 = vrsqrt.f32 %v1001_v24  ;;  %vm1009_vm6 = vweird.f32 %v1001_v24 }
 0x6b6   :  { %v2172_v4 = vpop.eup %2171 }
 0x6b7   :  { %v1004_v7 = vmul.f32 %v2172_v4, %v1001_v24  ;;  %vm1010_vm7 = vweird.f32 %v2172_v4 }
 0x6b8   :  { %vm1011_vm8 = vmor %vm1009_vm6, %vm1010_vm7 }
 0x6b9   :  { %v1005_v8 = vmul.f32 %v2172_v4, %v1004_v7 }
 0x6bb   :  { %v1006_v9 = vmul.f32 0.5, %v1005_v8 }
 0x6bd   :  { %v1007_v10 = vsub.f32 1.5, %v1006_v9 }
 0x6be   :  { %v2095_v1 = vpop.permute.xlu0 %2094 }
 0x6bf   :  { %v2096_v2 = vunpack.i.l.bf16 %v2095_v1  ;;  %v2097_v3 = vunpack.i.h.bf16 %v2095_v1  ;;  %v1008_v27 = vmul.f32 %v2172_v4, %v1007_v10 }
 0x6c1   :  { %1094 = vmatpush.msra.mxu0 %v2096_v2  ;;  %v1012_v18 = vsel %vm1011_vm8, %v2172_v4, %v1008_v27 }
 0x6c2   :  { %v1023_v31 = vmul.f32 %v1012_v18, %v2541_v21 }
 0x6c3   :  { %2099 = vrot.lane.b32.xlu2 %v2585_v0, %s2219_s11  ;;  %1095 = vmatpush.msra.mxu0 %v2097_v3 }
 0x6c4   :  { %v1026_v32 = vmul.f32 %v1025_v30, %v1023_v31 }
 0x6c6   :  { %v1029_v21 = vadd.f32 %v1028_v34, %v1026_v32 }
 0x716   :  { %v947_v35 = vpop.xlane.xlu1 %946 }
 0x717   :  { %v951_v26 = vmul.f32 %v947_v35, %v2313_v28 }
 0x719   :  { %v953_v11 = vadd.f32 1e-05, %v951_v26 }
 0x71b   :  { %2173 = vrsqrt.f32 %v953_v11  ;;  %vm961_vm10 = vweird.f32 %v953_v11 }
 0x71e   :  { %v998_v13 = vpop.xlane.xlu1 %997  ;;  %v950_v16 = vpop.xlane.xlu2 %949 }
 0x71f   :  { %v1000_v20 = vmul.f32 %v998_v13, %v2313_v28  ;;  %v952_v22 = vmul.f32 %v950_v16, %v2313_v28 }
 0x721   :  { %v2174_v23 = vpop.eup %2173  ;;  %v1002_v25 = vadd.f32 1e-05, %v1000_v20  ;;  %v954_v29 = vadd.f32 1e-05, %v952_v22 }
 0x722   :  { %v956_v19 = vmul.f32 %v2174_v23, %v953_v11  ;;  %vm962_vm9 = vweird.f32 %v2174_v23 }
 0x723   :  { %2175 = vrsqrt.f32 %v1002_v25  ;;  %vm963_vm12 = vmor %vm961_vm10, %vm962_vm9  ;;  %vm1019_vm15 = vweird.f32 %v1002_v25  ;;  %vm971_vm2 = vweird.f32 %v954_v29 }
 0x724   :  { %v957_v33 = vmul.f32 %v2174_v23, %v956_v19  ;;  %2177 = vrsqrt.f32 %v954_v29 }
 0x726   :  { %v958_v15 = vmul.f32 0.5, %v957_v33  ;;  %v2100_v17 = vpop.permute.xlu2 %2099 }
 0x727   :  { %v2102_v5 = vunpack.i.h.bf16 %v2100_v17  ;;  %v2101_v12 = vunpack.i.l.bf16 %v2100_v17 }
 0x728   :  { %v959_v37 = vsub.f32 1.5, %v958_v15 }
 0x729   :  { %v2176_v38 = vpop.eup %2175  ;;  %1096 = vmatpush.msra.mxu0 %v2101_v12 }
 0x72a   :  { %v2178_v39 = vpop.eup %2177  ;;  %v960_v14 = vmul.f32 %v2174_v23, %v959_v37  ;;  %v1014_v41 = vmul.f32 %v2176_v38, %v1002_v25  ;;  %vm1020_vm13 = vweird.f32 %v2176_v38 }
 0x72b   :  { %v966_v43 = vmul.f32 %v2178_v39, %v954_v29  ;;  %1097 = vmatpush.msra.mxu0 %v2102_v5  ;;  %vm972_vm14 = vweird.f32 %v2178_v39  ;;  %vm1021_vm1 = vmor %vm1019_vm15, %vm1020_vm13 }
 0x72c   :  { %v964_v44 = vsel %vm963_vm12, %v2174_v23, %v960_v14  ;;  %v1015_v6 = vmul.f32 %v2176_v38, %v1014_v41  ;;  %2003 = vmatmul.msk.f32.vlgmr.msra.gmra.mxu0 %vm91_vm3, %v1029_v21  ;;  %vm973_vm4 = vmor %vm971_vm2, %vm972_vm14 }
 0x72d   :  { %v975_v56 = vmul.f32 %v964_v44, %v2561_v45  ;;  %v967_v46 = vmul.f32 %v2178_v39, %v966_v43 }
 0x72e   :  { %v1016_v47 = vmul.f32 0.5, %v1015_v6 }
 0x72f   :  { %v977_v48 = vmul.f32 %v975_v56, %v2329_v58  ;;  %v968_v40 = vmul.f32 0.5, %v967_v46 }
 0x730   :  { %v1017_v51 = vsub.f32 1.5, %v1016_v47 }
 0x731   :  { %v969_v49 = vsub.f32 1.5, %v968_v40  ;;  %v979_v54 = vadd.f32 %v977_v48, %v2332_v61 }
 0x732   :  { %v1018_v55 = vmul.f32 %v2176_v38, %v1017_v51 }
 0x733   :  { %v970_v57 = vmul.f32 %v2178_v39, %v969_v49  ;;  %2001 = vmatmul.msk.f32.vlgmr.msra.gmra.mxu2 %vm91_vm3, %v979_v54 }
 0x734   :  { %v1022_v60 = vsel %vm1021_vm1, %v2176_v38, %v1018_v55 }
 0x735   :  { %v974_v45 = vsel %vm973_vm4, %v2178_v39, %v970_v57  ;;  %v1024_v63 = vmul.f32 %v1022_v60, %v2571_v52 }
 0x736   :  { %v976_v50 = vmul.f32 %v974_v45, %v2574_v53 }
 0x737   :  { %v1027_v62 = vmul.f32 %v1025_v30, %v1024_v63 }
 0x738   :  { %v978_v24 = vmul.f32 %v976_v50, %v2329_v58 }
 0x739   :  { %v1030_v1 = vadd.f32 %v1028_v34, %v1027_v62 }
 0x73a   :  { %v980_v2 = vadd.f32 %v978_v24, %v2332_v61 }
 0x73b   :  { %2004 = vmatmul.msk.f32.gmra.mxu0 %vm91_vm3, %v1030_v1 }
 0x73c   :  { %2002 = vmatmul.msk.f32.gmra.mxu2 %vm91_vm3, %v980_v2 }
 0x7a9   :  { %v2607_v3 = vpop.f32.mrf.mxu0 }
 0x7aa   :  { %1261 = vrot.lane.b32.xlu2 %v2607_v3, %s2220_s14  ;;  %2005 = vmatpush.xpose.msk.msrb.mxu3 %vm221_vm11, %v2607_v3 }
 0x7b6   :  { %v1054_v52 = vpop.f32.mrf.mxu2 }
 0x7b7   :  { %1259 = vrot.lane.b32.xlu0 %v1054_v52, %s2220_s14  ;;  %2006 = vmatmul.msk.f32.vlgmr.msrb.gmra.mxu3 %vm221_vm11, %v1054_v52 }
 0x7b8   :  { %v2615_v58 = vpop.f32.mrf.mxu0 }
 0x7b9   :  { %1289 = vrot.lane.b32.xlu1 %v2615_v58, %s2220_s14  ;;  %2007 = vmatpush.xpose.msk.msra.mxu3 %vm221_vm11, %v2615_v58  ;;  %v2665_v57 = vpack.i.bf16 %v2615_v58, %v2607_v3 }
 0x7bf   :  { %v1057_v61 = vpop.f32.mrf.mxu2 }
 0x7c0   :  { %1287 = vrot.lane.b32.xlu0 %v1057_v61, %s2220_s14  ;;  %1445 = vrot.lane.b32.xlu2 %v1057_v61, %s2221_s15 }
 0x7c1   :  { %2008 = vmatmul.msk.f32.vlgmr.msra.gmra.mxu3 %vm221_vm11, %v1057_v61  ;;  %1447 = vrot.lane.b32.xlu1 %v2615_v58, %s2221_s15 }
 0x7c8   :  { %1419 = vrot.lane.b32.xlu0 %v2607_v3, %s2221_s15  ;;  %1605 = vrot.lane.b32.xlu2 %v2615_v58, %s2222_s16 }
 0x7c9   :  { %1417 = vrot.lane.b32.xlu1 %v1054_v52, %s2221_s15 }
 0x7d0   :  { %1603 = vrot.lane.b32.xlu0 %v1057_v61, %s2222_s16  ;;  %1575 = vrot.lane.b32.xlu2 %v1054_v52, %s2222_s16 }
 0x7d1   :  { %1577 = vrot.lane.b32.xlu1 %v2607_v3, %s2222_s16 }
 0x804   :  { %v1262_v53 = vpop.permute.xlu2 %1261 }
 0x805   :  { %2011 = vmatpush.xpose.msk.msrb.mxu0 %vm221_vm11, %v1262_v53 }
 0x81a   :  { %v1446_v7 = vpop.permute.xlu2 %1445 }
 0x822   :  { %v1606_v10 = vpop.permute.xlu2 %1605 }
 0x829   :  { %v1260_v4 = vpop.permute.xlu0 %1259 }
 0x82a   :  { %2012 = vmatmul.msk.f32.vlgmr.msrb.gmra.mxu0 %vm221_vm11, %v1260_v4  ;;  %v1576_v25 = vpop.permute.xlu2 %1575 }
 0x82b   :  { %v1290_v8 = vpop.permute.xlu1 %1289 }
 0x82c   :  { %2013 = vmatpush.xpose.msk.msrb.mxu3 %vm221_vm11, %v1290_v8 }
 0x832   :  { %v1288_v9 = vpop.permute.xlu0 %1287 }
 0x833   :  { %2014 = vmatmul.msk.f32.vlgmr.msrb.gmra.mxu3 %vm221_vm11, %v1288_v9  ;;  %v1448_v35 = vpop.permute.xlu1 %1447 }
 0x834   :  { %2019 = vmatpush.xpose.msk.msra.mxu3 %vm221_vm11, %v1448_v35 }
 0x838   :  { %2025 = vmatpush.xpose.msk.msrb.mxu3 %vm221_vm11, %v1606_v10 }
 0x83a   :  { %v1420_v26 = vpop.permute.xlu0 %1419  ;;  %v1128_v11 = vpop.f32.mrf.mxu3 }
 0x83b   :  { %v1157_v27 = vmul.f32 0.35355338, %v1128_v11  ;;  %2017 = vmatpush.xpose.msk.msra.mxu0 %vm221_vm11, %v1420_v26  ;;  %2020 = vmatmul.msk.f32.vlgmr.msra.gmra.mxu3 %vm221_vm11, %v1446_v7  ;;  %v1418_v13 = vpop.permute.xlu1 %1417 }
 0x83d   :  { %v1159_v16 = vsel %vm221_vm11, %v1157_v27, -inf }
 0x83e   :  { %2018 = vmatmul.msk.f32.vlgmr.msra.gmra.mxu0 %vm221_vm11, %v1418_v13  ;;  %1160 = vmax.xlane.f32.xlu0 %v1159_v16 }
 0x842   :  { %v1604_v18 = vpop.permute.xlu0 %1603 }
 0x843   :  { %2026 = vmatmul.msk.f32.vlgmr.msrb.gmra.mxu3 %vm221_vm11, %v1604_v18  ;;  %v1578_v20 = vpop.permute.xlu1 %1577 }
 0x844   :  { %v1154_v22 = vpop.f32.mrf.mxu3  ;;  %2023 = vmatpush.xpose.msk.msrb.mxu0 %vm221_vm11, %v1578_v20 }
 0x845   :  { %v1158_v23 = vmul.f32 0.35355338, %v1154_v22 }
 0x847   :  { %v1162_v29 = vsel %vm221_vm11, %v1158_v23, -inf  ;;  %2024 = vmatmul.msk.f32.vlgmr.msrb.gmra.mxu0 %vm221_vm11, %v1576_v25 }
 0x848   :  { %1163 = vmax.xlane.f32.xlu1 %v1162_v29 }
 0x8a7   :  { %v1284_v30 = vpop.f32.mrf.mxu0 }
 0x8a8   :  { %v1315_v31 = vmul.f32 0.35355338, %v1284_v30 }
 0x8aa   :  { %v1317_v19 = vsel %vm221_vm11, %v1315_v31, -inf }
 0x8ab   :  { %1318 = vmax.xlane.f32.xlu2 %v1317_v19 }
 0x8b1   :  { %v1161_v33 = vpop.xlane.xlu0 %1160 }
 0x8b2   :  { %v1165_v32 = vsub.f32 %v1157_v27, %v1161_v33 }
 0x8b4   :  { %v1167_v15 = vmul.f32 1.442695, %v1165_v32 }
 0x8b6   :  { %2179 = vpow2.f32 %v1167_v15  ;;  %v1312_v17 = vpop.f32.mrf.mxu3 }
 0x8b7   :  { %v1316_v34 = vmul.f32 0.35355338, %v1312_v17 }
 0x8b9   :  { %v1320_v5 = vsel %vm221_vm11, %v1316_v34, -inf }
 0x8ba   :  { %1321 = vmax.xlane.f32.xlu0 %v1320_v5 }
 0x8bb   :  { %v1164_v12 = vpop.xlane.xlu1 %1163  ;;  %v1442_v37 = vpop.f32.mrf.mxu0 }
 0x8bc   :  { %v2651_v38 = vpop.eup %2179  ;;  %v1473_v39 = vmul.f32 0.35355338, %v1442_v37  ;;  %v1166_v41 = vsub.f32 %v1158_v23, %v1164_v12 }
 0x8bd   :  { %v1171_v14 = vsel %vm221_vm11, %v2651_v38, 0.0 }
 0x8be   :  { %v1470_v21 = vpop.f32.mrf.mxu3  ;;  %1172 = vadd.xlane.f32.xlu2 %v1171_v14  ;;  %v1475_v43 = vsel %vm221_vm11, %v1473_v39, -inf  ;;  %v1169_v6 = vmul.f32 1.442695, %v1166_v41 }
 0x8bf   :  { %1476 = vmax.xlane.f32.xlu1 %v1475_v43  ;;  %v1474_v44 = vmul.f32 0.35355338, %v1470_v21 }
 0x8c0   :  { %2181 = vpow2.f32 %v1169_v6 }
 0x8c1   :  { %v1478_v47 = vsel %vm221_vm11, %v1474_v44, -inf }
 0x8c4   :  { %v1600_v56 = vpop.f32.mrf.mxu0 }
 0x8c5   :  { %v1631_v46 = vmul.f32 0.35355338, %v1600_v56 }
 0x8c6   :  { %v1628_v48 = vpop.f32.mrf.mxu3  ;;  %1479 = vmax.xlane.f32.xlu2 %v1478_v47  ;;  %v2659_v54 = vpop.eup %2181 }
 0x8c7   :  { %v1632_v40 = vmul.f32 0.35355338, %v1628_v48  ;;  %v1633_v51 = vsel %vm221_vm11, %v1631_v46, -inf  ;;  %v1174_v55 = vsel %vm221_vm11, %v2659_v54, 0.0 }
 0x8c8   :  { %1634 = vmax.xlane.f32.xlu0 %v1633_v51 }
 0x8c9   :  { %v1636_v49 = vsel %vm221_vm11, %v1632_v40, -inf }
 0x8ca   :  { %1637 = vmax.xlane.f32.xlu1 %v1636_v49 }
 0x8d0   :  { %1175 = vadd.xlane.f32.xlu0 %v1174_v55 }
 0x8de   :  { %2104 = vrot.lane.b32.xlu2 %v2665_v57, %s2219_s11 }
 0x91e   :  { %v1319_v60 = vpop.xlane.xlu2 %1318 }
 0x91f   :  { %v1323_v45 = vsub.f32 %v1315_v31, %v1319_v60 }
 0x921   :  { %v1325_v63 = vmul.f32 1.442695, %v1323_v45 }
 0x923   :  { %2183 = vpow2.f32 %v1325_v63 }
 0x929   :  { %v2669_v50 = vpop.eup %2183 }
 0x92a   :  { %v1329_v62 = vsel %vm221_vm11, %v2669_v50, 0.0 }
 0x92b   :  { %1330 = vadd.xlane.f32.xlu1 %v1329_v62 }
 0x92d   :  { %v1322_v24 = vpop.xlane.xlu0 %1321 }
 0x92e   :  { %v1324_v1 = vsub.f32 %v1316_v34, %v1322_v24 }
 0x930   :  { %v1327_v2 = vmul.f32 1.442695, %v1324_v1 }
 0x931   :  { %v1173_v52 = vpop.xlane.xlu2 %1172 }
 0x932   :  { %2185 = vpow2.f32 %v1327_v2  ;;  %v1477_v3 = vpop.xlane.xlu1 %1476  ;;  %v1186_v16 = vand.u32 2147483647, %v1173_v52  ;;  %v1188_v18 = vand.u32 2147483648, %v1173_v52  ;;  %vm1182_vm7 = vweird.f32 %v1173_v52 }
 0x933   :  { %2187 = vrcp.f32 %v1173_v52  ;;  %v1481_v58 = vsub.f32 %v1473_v39, %v1477_v3 }
 0x934   :  { %v1189_v19 = vor.u32 1.1754944e-38, %v1188_v18  ;;  %vm1187_vm9 = vcmp.eq.f32.partialorder %v1186_v16, 8.507059e+37 }
 0x935   :  { %v1483_v61 = vmul.f32 1.442695, %v1481_v58 }
 0x937   :  { %2189 = vpow2.f32 %v1483_v61 }
 0x938   :  { %v2673_v53 = vpop.eup %2185 }
 0x939   :  { %v2188_v4 = vpop.eup %2187  ;;  %v1480_v7 = vpop.xlane.xlu2 %1479  ;;  %v1332_v8 = vsel %vm221_vm11, %v2673_v53, 0.0 }
 0x93a   :  { %v1178_v9 = vmul.f32 %v2188_v4, %v1173_v52  ;;  %v1482_v35 = vsub.f32 %v1474_v44, %v1480_v7  ;;  %1333 = vadd.xlane.f32.xlu2 %v1332_v8  ;;  %vm1183_vm6 = vweird.f32 %v2188_v4 }
 0x93b   :  { %v1635_v10 = vpop.xlane.xlu0 %1634  ;;  %vm1184_vm8 = vmor %vm1182_vm7, %vm1183_vm6 }
 0x93c   :  { %v1179_v26 = vsub.f32 1.0, %v1178_v9  ;;  %v1485_v11 = vmul.f32 1.442695, %v1482_v35  ;;  %v1639_v27 = vsub.f32 %v1631_v46, %v1635_v10 }
 0x93d   :  { %v2677_v13 = vpop.eup %2189  ;;  %v1638_v20 = vpop.xlane.xlu1 %1637 }
 0x93e   :  { %v1180_v22 = vmul.f32 %v2188_v4, %v1179_v26  ;;  %2191 = vpow2.f32 %v1485_v11  ;;  %v1641_v23 = vmul.f32 1.442695, %v1639_v27  ;;  %v1640_v25 = vsub.f32 %v1632_v40, %v1638_v20 }
 0x93f   :  { %v1487_v29 = vsel %vm221_vm11, %v2677_v13, 0.0 }
 0x940   :  { %v1181_v30 = vadd.f32 %v2188_v4, %v1180_v22  ;;  %2193 = vpow2.f32 %v1641_v23  ;;  %v1643_v31 = vmul.f32 1.442695, %v1640_v25  ;;  %1488 = vadd.xlane.f32.xlu0 %v1487_v29 }
 0x941   :  { %v2105_v33 = vpop.permute.xlu2 %2104 }
 0x942   :  { %v1185_v32 = vsel %vm1184_vm8, %v2188_v4, %v1181_v30  ;;  %v2107_v15 = vunpack.i.h.bf16 %v2105_v33  ;;  %v2106_v17 = vunpack.i.l.bf16 %v2105_v33  ;;  %2195 = vpow2.f32 %v1643_v31 }
 0x943   :  { %v1190_v34 = vsel %vm1187_vm9, %v1189_v19, %v1185_v32  ;;  %v1176_v5 = vpop.xlane.xlu0 %1175 }
 0x944   :  { %v2681_v12 = vpop.eup %2191  ;;  %2197 = vrcp.f32 %v1176_v5  ;;  %1228 = vmatpush.msra.mxu1 %v2106_v17  ;;  %1254 = vmatpush.msrb.mxu2 %v2107_v15  ;;  %v1191_v37 = vmul.f32 %v2651_v38, %v1190_v34  ;;  %v1203_v56 = vand.u32 2147483648, %v1176_v5  ;;  %v1201_v47 = vand.u32 2147483647, %v1176_v5 }
 0x945   :  { %v1490_v39 = vsel %vm221_vm11, %v2681_v12, 0.0  ;;  %vm1197_vm12 = vweird.f32 %v1176_v5 }
 0x946   :  { %v2686_v14 = vpop.eup %2193  ;;  %1491 = vadd.xlane.f32.xlu1 %v1490_v39  ;;  %2009 = vmatmul.msk.f32.vlgmr.msra.gmra.mxu1 %vm221_vm11, %v1191_v37  ;;  %v1204_v40 = vor.u32 1.1754944e-38, %v1203_v56  ;;  %vm1202_vm14 = vcmp.eq.f32.partialorder %v1201_v47, 8.507059e+37 }
 0x947   :  { %v1645_v41 = vsel %vm221_vm11, %v2686_v14, 0.0 }
 0x948   :  { %1646 = vadd.xlane.f32.xlu0 %v1645_v41  ;;  %v2691_v21 = vpop.eup %2195 }
 0x949   :  { %v1648_v38 = vsel %vm221_vm11, %v2691_v21, 0.0 }
 0x94a   :  { %v2198_v43 = vpop.eup %2197 }
 0x94b   :  { %v1193_v44 = vmul.f32 %v2198_v43, %v1176_v5  ;;  %vm1198_vm10 = vweird.f32 %v2198_v43 }
 0x94c   :  { %vm1199_vm13 = vmor %vm1197_vm12, %vm1198_vm10 }
 0x94d   :  { %v1194_v6 = vsub.f32 1.0, %v1193_v44 }
 0x94e   :  { %1649 = vadd.xlane.f32.xlu1 %v1648_v38 }
 0x94f   :  { %v1195_v46 = vmul.f32 %v2198_v43, %v1194_v6 }
 0x951   :  { %v1196_v48 = vadd.f32 %v2198_v43, %v1195_v46 }
 0x952   :  { %2119 = vrot.lane.b32.xlu2 %v2665_v57, %s2224_s17 }
 0x953   :  { %v1200_v51 = vsel %vm1199_vm13, %v2198_v43, %v1196_v48 }
 0x954   :  { %v1205_v49 = vsel %vm1202_vm14, %v1204_v40, %v1200_v51 }
 0x955   :  { %v1206_v55 = vmul.f32 %v2659_v54, %v1205_v49 }
 0x957   :  { %2010 = vmatmul.msk.f32.vlgmr.msrb.gmra.mxu2 %vm221_vm11, %v1206_v55 }
 0x95c   :  { %2109 = vrot.lane.b32.xlu0 %v2665_v57, %s2225_s18 }
 0x964   :  { %2124 = vrot.lane.b32.xlu0 %v2555_v42, %s2227_s20 }
 0x967   :  { %2114 = vrot.lane.b32.xlu1 %v2665_v57, %s2226_s19 }
 0x96c   :  { %2129 = vrot.lane.b32.xlu0 %v2585_v0, %s2227_s20 }
 0x99e   :  { %v1331_v60 = vpop.xlane.xlu1 %1330 }
 0x99f   :  { %2199 = vrcp.f32 %v1331_v60  ;;  %v1346_v26 = vand.u32 2147483648, %v1331_v60  ;;  %vm1340_vm2 = vweird.f32 %v1331_v60  ;;  %v1344_v27 = vand.u32 2147483647, %v1331_v60 }
 0x9a1   :  { %v1347_v30 = vor.u32 1.1754944e-38, %v1346_v26  ;;  %vm1345_vm8 = vcmp.eq.f32.partialorder %v1344_v27, 8.507059e+37 }
 0x9a5   :  { %v2200_v63 = vpop.eup %2199 }
 0x9a6   :  { %v1336_v1 = vmul.f32 %v2200_v63, %v1331_v60  ;;  %vm1341_vm15 = vweird.f32 %v2200_v63 }
 0x9a7   :  { %vm1342_vm4 = vmor %vm1340_vm2, %vm1341_vm15 }
 0x9a8   :  { %v1337_v52 = vsub.f32 1.0, %v1336_v1 }
 0x9aa   :  { %v1338_v61 = vmul.f32 %v2200_v63, %v1337_v52 }
 0x9ac   :  { %v1339_v35 = vadd.f32 %v2200_v63, %v1338_v61  ;;  %v25_v61 = vld [vmem:[%s2915_s3 + $0x10] sm:$0xff] }
 0x9ad   :  { %v1334_v45 = vpop.xlane.xlu2 %1333 }
 0x9ae   :  { %2201 = vrcp.f32 %v1334_v45  ;;  %v1361_v16 = vand.u32 2147483648, %v1334_v45  ;;  %vm1355_vm6 = vweird.f32 %v1334_v45  ;;  %v1359_v18 = vand.u32 2147483647, %v1334_v45 }
 0x9af   :  { %v1343_v23 = vsel %vm1342_vm4, %v2200_v63, %v1339_v35 }
 0x9b0   :  { %v1362_v19 = vor.u32 1.1754944e-38, %v1361_v16  ;;  %v1348_v33 = vsel %vm1345_vm8, %v1347_v30, %v1343_v23  ;;  %vm1360_vm9 = vcmp.eq.f32.partialorder %v1359_v18, 8.507059e+37 }
 0x9b1   :  { %v1349_v43 = vmul.f32 %v2669_v50, %v1348_v33 }
 0x9b3   :  { %v2703_v24 = vpop.xlane.xlu0 %1488 }
 0x9b4   :  { %v2202_v62 = vpop.eup %2201  ;;  %2203 = vrcp.f32 %v2703_v24  ;;  %vm1498_vm13 = vweird.f32 %v2703_v24  ;;  %v1504_v0 = vand.u32 2147483648, %v2703_v24  ;;  %v1502_v50 = vand.u32 2147483647, %v2703_v24 }
 0x9b5   :  { %v1351_v54 = vmul.f32 %v2202_v62, %v1334_v45  ;;  %vm1356_vm1 = vweird.f32 %v2202_v62  ;;  %v2120_v63 = vpop.permute.xlu2 %2119 }
 0x9b6   :  { %vm1357_vm7 = vmor %vm1355_vm6, %vm1356_vm1  ;;  %v1505_v49 = vor.u32 1.1754944e-38, %v1504_v0  ;;  %vm1503_vm2 = vcmp.eq.f32.partialorder %v1502_v50, 8.507059e+37  ;;  %v2122_v35 = vunpack.i.h.bf16 %v2120_v63  ;;  %v2798_v0 = vld [vmem:[%s2916_s5] sm:$0xff] }
 0x9b7   :  { %v1352_v3 = vsub.f32 1.0, %v1351_v54 }
 0x9b9   :  { %v2705_v2 = vpop.xlane.xlu1 %1491  ;;  %v1353_v8 = vmul.f32 %v2202_v62, %v1352_v3 }
 0x9ba   :  { %2205 = vrcp.f32 %v2705_v2  ;;  %v2711_v57 = vpop.eup %2203  ;;  %v1519_v46 = vand.u32 2147483648, %v2705_v2  ;;  %vm1513_vm15 = vweird.f32 %v2705_v2 }
 0x9bb   :  { %v2709_v58 = vpop.xlane.xlu0 %1646  ;;  %v1494_v9 = vmul.f32 %v2711_v57, %v2703_v24  ;;  %v1354_v11 = vadd.f32 %v2202_v62, %v1353_v8  ;;  %vm1499_vm10 = vweird.f32 %v2711_v57 }
 0x9bc   :  { %2207 = vrcp.f32 %v2709_v58  ;;  %vm1500_vm14 = vmor %vm1498_vm13, %vm1499_vm10  ;;  %v1520_v55 = vor.u32 1.1754944e-38, %v1519_v46  ;;  %vm1656_vm6 = vweird.f32 %v2709_v58  ;;  %v1660_v24 = vand.u32 2147483647, %v2709_v58 }
 0x9bd   :  { %v1495_v20 = vsub.f32 1.0, %v1494_v9  ;;  %v1358_v31 = vsel %vm1357_vm7, %v2202_v62, %v1354_v11  ;;  %v1662_v54 = vand.u32 2147483648, %v2709_v58  ;;  %v1763_v46 = vperm.slane %v2798_v0, 7 }
 0x9be   :  { %v1363_v42 = vsel %vm1360_vm9, %v1362_v19, %v1358_v31  ;;  %vm1661_vm13 = vcmp.eq.f32.partialorder %v1660_v24, 8.507059e+37 }
 0x9bf   :  { %v1496_v32 = vmul.f32 %v2711_v57, %v1495_v20  ;;  %v1364_v44 = vmul.f32 %v2673_v53, %v1363_v42  ;;  %v1517_v53 = vand.u32 2147483647, %v2705_v2 }
 0x9c0   :  { %v2715_v7 = vpop.eup %2205 }
 0x9c1   :  { %v2713_v4 = vpop.xlane.xlu1 %1649  ;;  %v1509_v10 = vmul.f32 %v2715_v7, %v2705_v2  ;;  %v1497_v41 = vadd.f32 %v2711_v57, %v1496_v32  ;;  %vm1514_vm12 = vweird.f32 %v2715_v7  ;;  %vm1518_vm4 = vcmp.eq.f32.partialorder %v1517_v53, 8.507059e+37 }
 0x9c2   :  { %2209 = vrcp.f32 %v2713_v4  ;;  %v2725_v22 = vpop.eup %2207  ;;  %vm1515_vm1 = vmor %vm1513_vm15, %vm1514_vm12  ;;  %v1677_v52 = vand.u32 2147483648, %v2713_v4  ;;  %vm1671_vm10 = vweird.f32 %v2713_v4 }
 0x9c3   :  { %v1510_v25 = vsub.f32 1.0, %v1509_v10  ;;  %v1652_v17 = vmul.f32 %v2725_v22, %v2709_v58  ;;  %v1501_v47 = vsel %vm1500_vm14, %v2711_v57, %v1497_v41  ;;  %vm1657_vm7 = vweird.f32 %v2725_v22  ;;  %v1230_v18 = vpop.f32.mrf.mxu1 }
 0x9c4   :  { %v1506_v60 = vsel %vm1503_vm2, %v1505_v49, %v1501_v47  ;;  %vm2763_vm9 = vmor %vm1656_vm6, %vm1657_vm7  ;;  %v2121_v10 = vunpack.i.l.bf16 %v2120_v63  ;;  %v1678_v11 = vor.u32 1.1754944e-38, %v1677_v52  ;;  %v37_v52 = vld [vmem:[%s2915_s3 + $0x70] sm:$0xff] }
 0x9c5   :  { %v1511_v15 = vmul.f32 %v2715_v7, %v1510_v25  ;;  %v1653_v38 = vsub.f32 1.0, %v1652_v17  ;;  %v1507_v8 = vmul.f32 %v2677_v13, %v1506_v60  ;;  %1876 = vmatpush.msra.mxu3 %v37_v52 }
 0x9c7   :  { %v1512_v6 = vadd.f32 %v2715_v7, %v1511_v15  ;;  %v1654_v40 = vmul.f32 %v2725_v22, %v1653_v38 }
 0x9c8   :  { %v2727_v29 = vpop.eup %2209 }
 0x9c9   :  { %v1667_v34 = vmul.f32 %v2727_v29, %v2713_v4  ;;  %v1516_v48 = vsel %vm1515_vm1, %v2715_v7, %v1512_v6  ;;  %v1655_v62 = vadd.f32 %v2725_v22, %v1654_v40  ;;  %vm1672_vm8 = vweird.f32 %v2727_v29 }
 0x9ca   :  { %v1521_v45 = vsel %vm1518_vm4, %v1520_v55, %v1516_v48  ;;  %v1675_v7 = vand.u32 2147483647, %v2713_v4  ;;  %vm1673_vm12 = vmor %vm1671_vm10, %vm1672_vm8  ;;  %v1663_v4 = vor.u32 1.1754944e-38, %v1662_v54 }
 0x9cb   :  { %v1668_v56 = vsub.f32 1.0, %v1667_v34  ;;  %v1522_v9 = vmul.f32 %v2681_v12, %v1521_v45  ;;  %v1659_v58 = vsel %vm2763_vm9, %v2725_v22, %v1655_v62 }
 0x9cc   :  { %vm1676_vm14 = vcmp.eq.f32.partialorder %v1675_v7, 8.507059e+37  ;;  %v1664_v13 = vsel %vm1661_vm13, %v1663_v4, %v1659_v58  ;;  %v1902_v58 = vld [vmem:[%s2918_s4 + $0x68] sm:$0xff] }
 0x9cd   :  { %v1669_v51 = vmul.f32 %v2727_v29, %v1668_v56  ;;  %v1665_v27 = vmul.f32 %v2686_v14, %v1664_v13 }
 0x9ce   :  { %v2110_v5 = vpop.permute.xlu0 %2109 }
 0x9cf   :  { %v2112_v37 = vunpack.i.h.bf16 %v2110_v5  ;;  %v2111_v39 = vunpack.i.l.bf16 %v2110_v5  ;;  %v1670_v1 = vadd.f32 %v2727_v29, %v1669_v51 }
 0x9d1   :  { %1386 = vmatpush.msrb.mxu1 %v2111_v39  ;;  %1412 = vmatpush.msra.mxu2 %v2112_v37  ;;  %v1674_v26 = vsel %vm1673_vm12, %v2727_v29, %v1670_v1 }
 0x9d2   :  { %2015 = vmatmul.msk.f32.vlgmr.msrb.gmra.mxu1 %vm221_vm11, %v1349_v43  ;;  %2016 = vmatmul.msk.f32.vlgmr.msra.gmra.mxu2 %vm221_vm11, %v1364_v44  ;;  %v1679_v12 = vsel %vm1676_vm14, %v1678_v11, %v1674_v26  ;;  %v1901_v11 = vld [vmem:[%s2918_s4 + $0x60] sm:$0xff] }
 0x9d3   :  { %v1680_v16 = vmul.f32 %v2691_v21, %v1679_v12 }
 0x9d6   :  { %v2125_v21 = vpop.permute.xlu0 %2124 }
 0x9d7   :  { %v2127_v31 = vunpack.i.h.bf16 %v2125_v21  ;;  %v2126_v19 = vunpack.i.l.bf16 %v2125_v21 }
 0x9d9   :  { %v2115_v2 = vpop.permute.xlu1 %2114  ;;  %1794 = vmatpush.msra.mxu0 %v2126_v19  ;;  %v1895_v19 = vld [vmem:[%s2918_s4 + $0x30] sm:$0xff] }
 0x9da   :  { %v2117_v3 = vunpack.i.h.bf16 %v2115_v2  ;;  %v2116_v57 = vunpack.i.l.bf16 %v2115_v2  ;;  %v1256_v20 = vpop.f32.mrf.mxu2 }
 0x9db   :  { %1795 = vmatpush.msra.mxu0 %v2127_v31  ;;  %v1851_v31 = vperm.slane %v2798_v0, 4 }
 0x9dc   :  { %1544 = vmatpush.msra.mxu1 %v2116_v57  ;;  %1570 = vmatpush.msrb.mxu2 %v2117_v3  ;;  %v33_v3 = vld [vmem:[%s2915_s3 + $0x50] sm:$0xff] }
 0x9dd   :  { %2021 = vmatmul.msk.f32.vlgmr.msra.gmra.mxu1 %vm221_vm11, %v1507_v8  ;;  %2022 = vmatmul.msk.f32.vlgmr.msrb.gmra.mxu2 %vm221_vm11, %v1522_v9  ;;  %v29_v57 = vld [vmem:[%s2915_s3 + $0x30] sm:$0xff] }
 0x9de   :  { %1702 = vmatpush.msrb.mxu1 %v2121_v10  ;;  %1728 = vmatpush.msra.mxu2 %v2122_v35  ;;  %v2130_v33 = vpop.permute.xlu0 %2129  ;;  %v1904_v35 = vld [vmem:[%s2918_s4 + $0x78] sm:$0xff]  ;;  %v1903_v10 = vld [vmem:[%s2918_s4 + $0x70] sm:$0xff] }
 0x9df   :  { %v2132_v32 = vunpack.i.h.bf16 %v2130_v33  ;;  %v2131_v42 = vunpack.i.l.bf16 %v2130_v33  ;;  %1877 = vmatpush.msra.mxu3 %v33_v3 }
 0x9e0   :  { %1906 = vmatpush.msra.mxu1 %v1904_v35 }
 0x9e1   :  { %1796 = vmatpush.msra.mxu0 %v2131_v42  ;;  %1878 = vmatpush.msra.mxu3 %v29_v57 }
 0x9e2   :  { %1907 = vmatpush.msra.mxu1 %v1903_v10 }
 0x9e3   :  { %1797 = vmatpush.msra.mxu0 %v2132_v32  ;;  %1879 = vmatpush.msra.mxu3 %v25_v61 }
 0x9e4   :  { %1908 = vmatpush.msra.mxu1 %v1902_v58 }
 0x9e5   :  { %2027 = vmatmul.msk.f32.vlgmr.msrb.gmra.mxu1 %vm221_vm11, %v1665_v27  ;;  %2028 = vmatmul.msk.f32.vlgmr.msra.gmra.mxu2 %vm221_vm11, %v1680_v16  ;;  %v1900_v27 = vld [vmem:[%s2918_s4 + $0x58] sm:$0xff] }
 0x9e6   :  { %1909 = vmatpush.msra.mxu1 %v1901_v11 }
 0x9e8   :  { %1910 = vmatpush.msra.mxu1 %v1900_v27 }
 0xa4f   :  { %v1388_v22 = vpop.f32.mrf.mxu1 }
 0xa50   :  { %1735 = vrot.lane.b32.xlu2 %v1388_v22, %s2228_s21 }
 0xa55   :  { %v1414_v23 = vpop.f32.mrf.mxu2 }
 0xa56   :  { %1737 = vrot.lane.b32.xlu0 %v1414_v23, %s2228_s21  ;;  %v1897_v23 = vld [vmem:[%s2918_s4 + $0x40] sm:$0xff] }
 0xa5a   :  { %v1546_v25 = vpop.f32.mrf.mxu1 }
 0xa5b   :  { %1743 = vrot.lane.b32.xlu1 %v1546_v25, %s2229_s22 }
 0xa60   :  { %v1572_v29 = vpop.f32.mrf.mxu2 }
 0xa62   :  { %v1704_v30 = vpop.f32.mrf.mxu1 }
 0xa63   :  { %1745 = vrot.lane.b32.xlu1 %v1572_v29, %s2229_s22  ;;  %1751 = vrot.lane.b32.xlu2 %v1704_v30, %s2230_s23  ;;  %v1896_v30 = vld [vmem:[%s2918_s4 + $0x38] sm:$0xff] }
 0xa68   :  { %v1730_v14 = vpop.f32.mrf.mxu2 }
 0xa6b   :  { %1753 = vrot.lane.b32.xlu2 %v1730_v14, %s2230_s23 }
 0xaaa   :  { %v1736_v15 = vpop.permute.xlu2 %1735 }
 0xaab   :  { %v1757_v34 = vsel %vm221_vm11, %v1230_v18, %v1736_v15  ;;  %v1899_v18 = vld [vmem:[%s2918_s4 + $0x50] sm:$0xff]  ;;  %v1854_v15 = vperm.slane %v2798_v0, 5 }
 0xaac   :  { %1911 = vmatpush.msra.mxu1 %v1899_v18 }
 0xabd   :  { %v1752_v17 = vpop.permute.xlu2 %1751 }
 0xac5   :  { %v1754_v6 = vpop.permute.xlu2 %1753 }
 0xac8   :  { %v1738_v41 = vpop.permute.xlu0 %1737 }
 0xac9   :  { %v1758_v43 = vsel %vm221_vm11, %v1256_v20, %v1738_v41 }
 0xacd   :  { %v1744_v5 = vpop.permute.xlu1 %1743 }
 0xace   :  { %v1759_v37 = vsel %vm59_vm0, %v1757_v34, %v1744_v5 }
 0xacf   :  { %v1761_v39 = vsel %vm886_vm5, %v1759_v37, %v1752_v17  ;;  %v1894_v17 = vld [vmem:[%s2918_s4 + $0x28] sm:$0xff]  ;;  %v1893_v37 = vld [vmem:[%s2918_s4 + $0x20] sm:$0xff] }
 0xad0   :  { %2029 = vmatmul.msk.f32.vlgmr.msra.gmra.mxu0 %vm91_vm3, %v1761_v39 }
 0xad5   :  { %v1746_v44 = vpop.permute.xlu1 %1745 }
 0xad6   :  { %v1760_v38 = vsel %vm59_vm0, %v1758_v43, %v1746_v44  ;;  %v1892_v43 = vld [vmem:[%s2918_s4 + $0x18] sm:$0xff] }
 0xad7   :  { %v1762_v56 = vsel %vm886_vm5, %v1760_v38, %v1754_v6 }
 0xad8   :  { %2030 = vmatmul.msk.f32.gmra.mxu0 %vm91_vm3, %v1762_v56 }
 0xb4d   :  { %v1799_v50 = vpop.f32.mrf.mxu0 }
 0xb4e   :  { %v1800_v53 = vadd.f32 %v1799_v50, %v1763_v46  ;;  %v1890_v50 = vld [vmem:[%s2918_s4 + $0x8] sm:$0xff] }
 0xb50   :  { %v2802_v47 = vadd.f32 %v1800_v53, %v2530_v59  ;;  %v1889_v53 = vld [vmem:[%s2918_s4] sm:$0xff] }
 0xb52   :  { %v1807_v48 = vsel %vm91_vm3, %v2802_v47, 0.0 }
 0xb53   :  { %1808 = vadd.xlane.f32.xlu0 %v1807_v48  ;;  %v38_v48 = vld [vmem:[%s2915_s3 + $0x78] sm:$0xff] }
 0xb54   :  { %1950 = vmatpush.msrb.mxu2 %v38_v48 }
 0xb55   :  { %v1802_v40 = vpop.f32.mrf.mxu0 }
 0xb56   :  { %v1803_v51 = vadd.f32 %v1802_v40, %v1763_v46  ;;  %v1891_v46 = vld [vmem:[%s2918_s4 + $0x10] sm:$0xff]  ;;  %v40_v40 = vld [vmem:[%s2916_s5 + $0x8] sm:$0x7] }
 0xb58   :  { %v2807_v49 = vadd.f32 %v1803_v51, %v2539_v36  ;;  %v1857_v51 = vperm.slane %v40_v40, 1 }
 0xb5a   :  { %v1810_v55 = vsel %vm91_vm3, %v2807_v49, 0.0 }
 0xb5b   :  { %1811 = vadd.xlane.f32.xlu1 %v1810_v55 }
 0xbc6   :  { %v1809_v60 = vpop.xlane.xlu0 %1808 }
 0xbc7   :  { %v1813_v45 = vmul.f32 %v1809_v60, %v2313_v28 }
 0xbc9   :  { %v1815_v63 = vsub.f32 %v2802_v47, %v1813_v45 }
 0xbcb   :  { %v1817_v59 = vmul.f32 %v1815_v63, %v1815_v63 }
 0xbcd   :  { %v1819_v62 = vsel %vm91_vm3, %v1817_v59, 0.0 }
 0xbce   :  { %1820 = vadd.xlane.f32.xlu2 %v1819_v62  ;;  %v1812_v24 = vpop.xlane.xlu1 %1811 }
 0xbcf   :  { %v1814_v1 = vmul.f32 %v1812_v24, %v2313_v28  ;;  %v34_v24 = vld [vmem:[%s2915_s3 + $0x58] sm:$0xff] }
 0xbd0   :  { %1951 = vmatpush.msrb.mxu2 %v34_v24 }
 0xbd1   :  { %v2816_v2 = vsub.f32 %v2807_v49, %v1814_v1  ;;  %v30_v1 = vld [vmem:[%s2915_s3 + $0x38] sm:$0xff] }
 0xbd2   :  { %1952 = vmatpush.msrb.mxu2 %v30_v1 }
 0xbd3   :  { %v1818_v36 = vmul.f32 %v2816_v2, %v2816_v2 }
 0xbd5   :  { %v1822_v54 = vsel %vm91_vm3, %v1818_v36, 0.0  ;;  %v1905_v36 = vperm.slane %v40_v40, 0 }
 0xbd6   :  { %1823 = vadd.xlane.f32.xlu0 %v1822_v54 }
 0xc41   :  { %v1821_v7 = vpop.xlane.xlu2 %1820 }
 0xc42   :  { %v1825_v8 = vmul.f32 %v1821_v7, %v2313_v28 }
 0xc44   :  { %v1827_v9 = vadd.f32 1e-05, %v1825_v8  ;;  %v1931_v8 = vperm.slane %v40_v40, 2 }
 0xc46   :  { %2211 = vrsqrt.f32 %v1827_v9  ;;  %vm1835_vm11 = vweird.f32 %v1827_v9 }
 0xc49   :  { %v1824_v26 = vpop.xlane.xlu0 %1823 }
 0xc4a   :  { %v1826_v4 = vmul.f32 %v1824_v26, %v2313_v28  ;;  %v1898_v28 = vld [vmem:[%s2918_s4 + $0x48] sm:$0xff] }
 0xc4b   :  { %1912 = vmatpush.msra.mxu1 %v1898_v28 }
 0xc4c   :  { %v2212_v13 = vpop.eup %2211  ;;  %v1828_v12 = vadd.f32 1e-05, %v1826_v4 }
 0xc4d   :  { %v1830_v16 = vmul.f32 %v2212_v13, %v1827_v9  ;;  %vm1836_vm0 = vweird.f32 %v2212_v13  ;;  %1913 = vmatpush.msra.mxu1 %v1897_v23 }
 0xc4e   :  { %2213 = vrsqrt.f32 %v1828_v12  ;;  %vm1837_vm5 = vmor %vm1835_vm11, %vm1836_vm0  ;;  %vm1845_vm1 = vweird.f32 %v1828_v12 }
 0xc4f   :  { %v1831_v20 = vmul.f32 %v2212_v13, %v1830_v16  ;;  %1914 = vmatpush.msra.mxu1 %v1896_v30 }
 0xc51   :  { %v1832_v22 = vmul.f32 0.5, %v1831_v20  ;;  %1915 = vmatpush.msra.mxu1 %v1895_v19 }
 0xc53   :  { %v1833_v25 = vsub.f32 1.5, %v1832_v22  ;;  %1916 = vmatpush.msra.mxu1 %v1894_v17 }
 0xc54   :  { %v2214_v29 = vpop.eup %2213 }
 0xc55   :  { %v1834_v14 = vmul.f32 %v2212_v13, %v1833_v25  ;;  %v1840_v21 = vmul.f32 %v2214_v29, %v1828_v12  ;;  %vm1846_vm15 = vweird.f32 %v2214_v29  ;;  %1917 = vmatpush.msra.mxu1 %v1893_v37 }
 0xc56   :  { %vm1847_vm2 = vmor %vm1845_vm1, %vm1846_vm15 }
 0xc57   :  { %v1838_v33 = vsel %vm1837_vm5, %v2212_v13, %v1834_v14  ;;  %v1841_v32 = vmul.f32 %v2214_v29, %v1840_v21  ;;  %1918 = vmatpush.msra.mxu1 %v1892_v43 }
 0xc58   :  { %v1849_v42 = vmul.f32 %v1838_v33, %v1815_v63 }
 0xc59   :  { %v1842_v34 = vmul.f32 0.5, %v1841_v32  ;;  %1919 = vmatpush.msra.mxu1 %v1891_v46 }
 0xc5a   :  { %v1852_v5 = vmul.f32 %v1851_v31, %v1849_v42 }
 0xc5b   :  { %v1843_v39 = vsub.f32 1.5, %v1842_v34  ;;  %1920 = vmatpush.msra.mxu1 %v1890_v50 }
 0xc5c   :  { %v1855_v41 = vadd.f32 %v1854_v15, %v1852_v5 }
 0xc5d   :  { %v1844_v44 = vmul.f32 %v2214_v29, %v1843_v39  ;;  %1921 = vmatpush.msra.mxu1 %v1889_v53 }
 0xc5e   :  { %2031 = vmatmul.msk.f32.vlgmr.msra.gmra.mxu3 %vm91_vm3, %v1855_v41 }
 0xc5f   :  { %v1848_v6 = vsel %vm1847_vm2, %v2214_v29, %v1844_v44 }
 0xc60   :  { %v1850_v38 = vmul.f32 %v1848_v6, %v2816_v2  ;;  %v26_v2 = vld [vmem:[%s2915_s3 + $0x18] sm:$0xff] }
 0xc61   :  { %1953 = vmatpush.msrb.mxu2 %v26_v2 }
 0xc62   :  { %v1853_v56 = vmul.f32 %v1851_v31, %v1850_v38 }
 0xc64   :  { %v1856_v0 = vadd.f32 %v1854_v15, %v1853_v56 }
 0xc66   :  { %2032 = vmatmul.msk.f32.gmra.mxu3 %vm91_vm3, %v1856_v0 }
 0xce1   :  { %v1881_v55 = vpop.f32.mrf.mxu3 }
 0xce2   :  { %v1882_v60 = vadd.f32 %v1881_v55, %v1857_v51 }
 0xce4   :  { %v1887_v45 = vmax.f32 %v1882_v60, 0.0 }
 0xce6   :  { %1922 = vmatmul.f32.vlgmr.msra.gmra.mxu1 %v1887_v45 }
 0xce9   :  { %v1884_v63 = vpop.f32.mrf.mxu3 }
 0xcea   :  { %v1885_v59 = vadd.f32 %v1884_v63, %v1857_v51 }
 0xcec   :  { %v1888_v62 = vmax.f32 %v1885_v59, 0.0 }
 0xcee   :  { %1925 = vmatmul.f32.gmra.mxu1 %v1888_v62 }
 0xd63   :  { %v1923_v54 = vpop.f32.mrf.mxu1 }
 0xd64   :  { %v1924_v52 = vadd.f32 %v1923_v54, %v1905_v36 }
 0xd66   :  { %v1929_v3 = vadd.f32 %v1924_v52, %v2802_v47 }
 0xd68   :  { %2033 = vmatmul.msk.f32.vlgmr.msrb.gmra.mxu2 %vm91_vm3, %v1929_v3 }
 0xd6b   :  { %v1926_v57 = vpop.f32.mrf.mxu1 }
 0xd6c   :  { %v1927_v61 = vadd.f32 %v1926_v57, %v1905_v36 }
 0xd6e   :  { %v1930_v7 = vadd.f32 %v1927_v61, %v2807_v49 }
 0xd70   :  { %2034 = vmatmul.msk.f32.gmra.mxu2 %vm91_vm3, %v1930_v7 }
 0xdeb   :  { %v1955_v9 = vpop.f32.mrf.mxu2 }
 0xdec   :  { %v1956_v35 = vadd.f32 %v1955_v9, %v1931_v8 }
 0xdee   :  { %1961 = vst [vmem:[%s2919_s6] sm:$0xff] %v1956_v35 }
 0xdf3   :  { %v1958_v10 = vpop.f32.mrf.mxu2 }
 0xdf4   :  { %v1959_v58 = vadd.f32 %v1958_v10, %v1931_v8 }
 0xdf6   :  { %1962 = vst [vmem:[%s2919_s6 + $0x8] sm:$0xff] %v1959_v58 }

</bundles_post_ra>
